<compile_context>
chip_gen: v6e
topology: v6e:2x2x1
jax: 0.10.0
libtpu: 0.0.40
codegen_flags: <defaults>
</compile_context>

<pallas_src>
import functools

import jax
import jax.numpy as jnp
from jax.experimental import pallas as pl
from jax.experimental.pallas import tpu as pltpu


# ----------------------------------------------------------------------------
# Small helpers
# ----------------------------------------------------------------------------
def _round_up(v, m):
    return (v + m - 1) // m * m


def _vmem_limit_bytes():
    """Generation-aware VMEM budget (v5e/v6e: 128 MiB physical, v7x: 64 MiB)."""
    cap = 64 * 1024 * 1024
    try:
        cap = int(pltpu.get_tpu_info().vmem_capacity_bytes)
    except Exception:
        pass
    return max(32 * 1024 * 1024, min(cap * 3 // 4, 96 * 1024 * 1024))


def _pick_tb(B, N, C, itemsize, vmem_limit):
    """Batch block size for the two-pass path.

    Divisor of B, multiple of 8 (sublane-aligned output rows), targeting
    >= 256 matmul rows per step while keeping the double-buffered x tile well
    inside the VMEM budget and >= 2 grid steps so the x DMA pipelines
    (megacore on v7x additionally splits the grid across two TensorCores).
    """
    cands = sorted(d for d in range(8, B + 1, 8) if B % d == 0)
    if not cands:
        return B
    budget = vmem_limit // 4
    afford = [d for d in cands if 2 * d * N * C * itemsize <= budget] or cands[:1]
    good = [d for d in afford if d * N >= 256]
    tb = good[0] if good else afford[-1]
    while B // tb < 2:
        smaller = [d for d in cands if d < tb]
        if not smaller:
            break
        tb = smaller[-1]
    return tb


def _fast_reciprocal(x):
    """1/x: EUP approximate reciprocal + one Newton step (~f32 exact)."""
    try:
        r = pl.reciprocal(x, approx=True)
    except Exception:           # very old Pallas: plain division
        return 1.0 / x
    return r * (2.0 - x * r)


# ----------------------------------------------------------------------------
# Shared attention tail: softmax over tokens, query-mean/head expansion,
# weighted reduction and classifier head.  v, logits are f32.
# ----------------------------------------------------------------------------
def _attention_tail(v, logits, wexp_ref, wl_ref, bl_ref, out_ref, xcls_ref,
                    *, nb, n_tok, c_pad, hq, compute_dtype):
    rows = nb * n_tok

    # Softmax over tokens (f32).
    m = jnp.max(logits, axis=1, keepdims=True)            # (nb, 1, HQ)
    p = jnp.exp(logits - m)
    denom = jnp.sum(p, axis=1, keepdims=True)
    p = p * _fast_reciprocal(denom)                        # (nb, N, HQ)

    # Query-mean + head->channel expansion as one small matmul
    # (w_exp = eye(H) (x) ones(Q, D) / Q, zero-padded to C_pad lanes).
    w = jnp.dot(p.reshape(rows, hq).astype(compute_dtype), wexp_ref[...],
                preferred_element_type=jnp.float32)        # (rows, C_pad)

    # x_cls[b, c] = sum_n w[b, n, c] * v[b, n, c]
    x_cls = jnp.sum((w * v).reshape(nb, n_tok, c_pad), axis=1)   # (nb, C_pad)

    out = jnp.dot(x_cls.astype(compute_dtype), wl_ref[...],
                  preferred_element_type=jnp.float32) + bl_ref[...]

    xcls_ref[...] = x_cls
    out_ref[...] = out


# ----------------------------------------------------------------------------
# Kernel A: single-pass fused kernel (x resident in VMEM).
# BN statistics computed in-kernel with a centered variance (no cancellation);
# the per-element normalize here is a one-time O(B*N*C) VPU op on the resident
# tile, far below the matmul cost at these sizes.
# ----------------------------------------------------------------------------
def _fused_kernel(x_ref, wv_ref, wlog_ref, wexp_ref, wl_ref, bl_ref,
                  out_ref, xcls_ref,
                  *, batch, n_tok, c_dim, c_pad, hq, eps, compute_dtype):
    rows = batch * n_tok
    x = x_ref[...].reshape(rows, c_dim).astype(jnp.float32)

    mean = jnp.mean(x, axis=0, keepdims=True)              # (1, C)
    xc = x - mean
    var = jnp.mean(xc * xc, axis=0, keepdims=True)         # biased variance
    xn = (xc * jax.lax.rsqrt(var + eps)).astype(compute_dtype)

    # Two lane-dense matmuls (no mid-vreg slicing of a fused output).
    v = jnp.dot(xn, wv_ref[...], preferred_element_type=jnp.float32)
    logits = jnp.dot(xn, wlog_ref[...],
                     preferred_element_type=jnp.float32).reshape(batch, n_tok, hq)

    _attention_tail(v, logits, wexp_ref, wl_ref, bl_ref, out_ref, xcls_ref,
                    nb=batch, n_tok=n_tok, c_pad=c_pad, hq=hq,
                    compute_dtype=compute_dtype)


# ----------------------------------------------------------------------------
# Kernel B1: per-block partial BN statistics (fully parallel grid).
# ----------------------------------------------------------------------------
def _bn_partial_kernel(x_ref, sum_ref, sumsq_ref, *, c_dim):
    x = x_ref[...].astype(jnp.float32).reshape(-1, c_dim)
    sum_ref[...] = jnp.sum(x, axis=0).reshape(1, 1, c_dim)
    sumsq_ref[...] = jnp.sum(x * x, axis=0).reshape(1, 1, c_dim)


# ----------------------------------------------------------------------------
# Kernel B2: attention pooling with BN folded into (wv, bv) / (wlog, blog),
# grid over batch blocks.  x is consumed directly in compute_dtype.
# ----------------------------------------------------------------------------
def _attn_pool_kernel(x_ref, wv_ref, bv_ref, wlog_ref, blog_ref, wexp_ref,
                      wl_ref, bl_ref, out_ref, xcls_ref,
                      *, tb, n_tok, c_dim, c_pad, hq, compute_dtype):
    rows = tb * n_tok
    x = x_ref[...].reshape(rows, c_dim).astype(compute_dtype)

    v = jnp.dot(x, wv_ref[...], preferred_element_type=jnp.float32) + bv_ref[...]
    logits = (jnp.dot(x, wlog_ref[...], preferred_element_type=jnp.float32)
              + blog_ref[...]).reshape(tb, n_tok, hq)

    _attention_tail(v, logits, wexp_ref, wl_ref, bl_ref, out_ref, xcls_ref,
                    nb=tb, n_tok=n_tok, c_pad=c_pad, hq=hq,
                    compute_dtype=compute_dtype)


# ----------------------------------------------------------------------------
# Wrapper
# ----------------------------------------------------------------------------
def attention_pooling_classifier(x, cls_token, wk_t, wv_t, wl_t, bl, *,
                                 num_heads, compute_dtype=jnp.float32,
                                 force_two_pass=False, eps=1e-6):
    """Forward pass of AttentionPoolingClassifier.

    x: (B, N, C); cls_token: (Q, C); wk_t, wv_t: (C, C) pre-transposed (in, out);
    wl_t: (C, OUT) pre-transposed; bl: (1, OUT).  qkv_bias=False.
    compute_dtype: matmul-operand dtype (bf16 is MXU-native on v5e/v6e/v7x;
    accumulation, BN statistics and softmax stay f32).
    Returns (out, x_cls) with shapes (B, OUT) and (B, C).
    """
    B, N, C = x.shape
    Q = cls_token.shape[0]
    OUT = wl_t.shape[1]
    H = num_heads
    D = C // H
    HQ = H * Q
    scale = float(D) ** -0.5
    f32 = jnp.float32
    hp = jax.lax.Precision.HIGHEST
    cp = jnp.dtype(compute_dtype)

    # Lane-dense output widths (<128-wide stores lower to masked vst).  These
    # are no-ops when C / OUT are already multiples of 128 (e.g. C=768).
    C_pad = _round_up(C, 128)
    OUT_pad = _round_up(OUT, 128)

    # --- one-time weight folding (plain XLA, negligible cost) ---------------
    # Per-(head, query) logit projection: q-scale folded into the K weight.
    q_scaled = (cls_token.astype(f32) * scale).reshape(Q, H, D)
    w_logit = jnp.einsum('chd,qhd->chq', wk_t.astype(f32).reshape(C, H, D),
                         q_scaled, precision=hp).reshape(C, HQ)
    # V projection, zero-padded to a 128-lane-aligned width.
    wv_pad = jnp.zeros((C, C_pad), f32).at[:, :C].set(wv_t.astype(f32))
    # Query-mean + head->channel expansion (eye(H) (x) ones(Q, D) / Q), padded.
    w_exp = jnp.kron(jnp.eye(H, dtype=f32), jnp.ones((Q, D), f32)) / Q
    wexp_pad = jnp.zeros((HQ, C_pad), f32).at[:, :C].set(w_exp)
    # Classifier head, padded on both sides (padded x_cls columns are zero).
    wl_pad = jnp.zeros((C_pad, OUT_pad), f32).at[:C, :OUT].set(wl_t.astype(f32))
    bl_pad = jnp.zeros((1, OUT_pad), f32).at[:, :OUT].set(
        jnp.reshape(bl, (1, OUT)).astype(f32))

    vmem_limit = _vmem_limit_bytes()
    x_bytes = jnp.dtype(x.dtype).itemsize
    c_bytes = cp.itemsize
    rows = B * N

    # Single-pass footprint estimate (x resident + f32 temps + weights).
    weight_elems = C * C_pad + C * HQ + HQ * C_pad + C_pad * OUT_pad
    est = (rows * C * (x_bytes + 4 + c_bytes)      # x, xn(f32), xn(compute)
           + 2 * rows * C_pad * 4                  # v, w
           + 2 * rows * HQ * 4                     # logits, p
           + weight_elems * c_bytes)
    single_pass = (not force_two_pass) and (2 * est <= vmem_limit)

    if single_pass:
        # One pallas_call: x read from HBM exactly once, no second launch.
        kernel = functools.partial(
            _fused_kernel, batch=B, n_tok=N, c_dim=C, c_pad=C_pad, hq=HQ,
            eps=eps, compute_dtype=compute_dtype)
        out_p, xcls_p = pl.pallas_call(
            kernel,
            grid=(1,),
            in_specs=[
                pl.BlockSpec((B, N, C), lambda i: (0, 0, 0)),       # x
                pl.BlockSpec((C, C_pad), lambda i: (0, 0)),         # Wv (padded)
                pl.BlockSpec((C, HQ), lambda i: (0, 0)),            # W_logit
                pl.BlockSpec((HQ, C_pad), lambda i: (0, 0)),        # expansion
                pl.BlockSpec((C_pad, OUT_pad), lambda i: (0, 0)),   # classifier W
                pl.BlockSpec((1, OUT_pad), lambda i: (0, 0)),       # classifier b
            ],
            out_specs=(pl.BlockSpec((B, OUT_pad), lambda i: (0, 0)),
                       pl.BlockSpec((B, C_pad), lambda i: (0, 0))),
            out_shape=(jax.ShapeDtypeStruct((B, OUT_pad), f32),
                       jax.ShapeDtypeStruct((B, C_pad), f32)),
            compiler_params=pltpu.CompilerParams(
                dimension_semantics=("arbitrary",),
                vmem_limit_bytes=vmem_limit),
        )(x, wv_pad.astype(cp), w_logit.astype(cp), wexp_pad.astype(cp),
          wl_pad.astype(cp), bl_pad)
    else:
        tb = _pick_tb(B, N, C, x_bytes, vmem_limit)
        nb = B // tb

        # Pass 1: per-block partial statistics; every step owns its output row
        # so the grid is fully parallel (no serial accumulator).
        psum, psumsq = pl.pallas_call(
            functools.partial(_bn_partial_kernel, c_dim=C),
            grid=(nb,),
            in_specs=[pl.BlockSpec((tb, N, C), lambda i: (i, 0, 0))],
            out_specs=(pl.BlockSpec((1, 1, C), lambda i: (i, 0, 0)),
                       pl.BlockSpec((1, 1, C), lambda i: (i, 0, 0))),
            out_shape=(jax.ShapeDtypeStruct((nb, 1, C), f32),
                       jax.ShapeDtypeStruct((nb, 1, C), f32)),
            compiler_params=pltpu.CompilerParams(
                dimension_semantics=("parallel",),
                vmem_limit_bytes=vmem_limit),
        )(x)

        # Finalize stats and fold BN into the projection weights (tiny XLA ops).
        # NOTE: sumsq - mean^2 can cancel if |mean| >> std; acceptable for
        # roughly-centered activations (clamped at 0).
        count = float(B * N)
        mean = jnp.sum(psum, axis=(0, 1)) / count                       # (C,)
        var = jnp.maximum(jnp.sum(psumsq, axis=(0, 1)) / count - mean * mean, 0.0)
        invstd = jax.lax.rsqrt(var + eps)
        shift = mean * invstd                                           # (C,)
        wv_bn = wv_pad * invstd[:, None]
        bv = -jnp.einsum('c,co->o', shift, wv_pad, precision=hp)[None, :]
        wlog_bn = w_logit * invstd[:, None]
        blog = -jnp.einsum('c,co->o', shift, w_logit, precision=hp)[None, :]

        # Pass 2: attention pooling + head; BN already folded into the weights.
        kernel = functools.partial(
            _attn_pool_kernel, tb=tb, n_tok=N, c_dim=C, c_pad=C_pad, hq=HQ,
            compute_dtype=compute_dtype)
        out_p, xcls_p = pl.pallas_call(
            kernel,
            grid=(nb,),
            in_specs=[
                pl.BlockSpec((tb, N, C), lambda i: (i, 0, 0)),       # x block
                pl.BlockSpec((C, C_pad), lambda i: (0, 0)),          # Wv (BN-folded)
                pl.BlockSpec((1, C_pad), lambda i: (0, 0)),          # bv
                pl.BlockSpec((C, HQ), lambda i: (0, 0)),             # W_logit (folded)
                pl.BlockSpec((1, HQ), lambda i: (0, 0)),             # blog
                pl.BlockSpec((HQ, C_pad), lambda i: (0, 0)),         # expansion
                pl.BlockSpec((C_pad, OUT_pad), lambda i: (0, 0)),    # classifier W
                pl.BlockSpec((1, OUT_pad), lambda i: (0, 0)),        # classifier b
            ],
            out_specs=(pl.BlockSpec((tb, OUT_pad), lambda i: (i, 0)),
                       pl.BlockSpec((tb, C_pad), lambda i: (i, 0))),
            out_shape=(jax.ShapeDtypeStruct((B, OUT_pad), f32),
                       jax.ShapeDtypeStruct((B, C_pad), f32)),
            compiler_params=pltpu.CompilerParams(
                dimension_semantics=("parallel",),
                vmem_limit_bytes=vmem_limit),
        )(x, wv_bn.astype(cp), bv, wlog_bn.astype(cp), blog,
          wexp_pad.astype(cp), wl_pad.astype(cp), bl_pad)

    out = out_p[:, :OUT] if OUT_pad != OUT else out_p
    x_cls = xcls_p[:, :C] if C_pad != C else xcls_p
    return out, x_cls


# ----------------------------------------------------------------------------
# Pure-JAX reference mirroring the PyTorch forward (highest matmul precision).
# ----------------------------------------------------------------------------
def _reference(x, cls_token, wk_t, wv_t, wl_t, bl, *, num_heads):
    B, N, C = x.shape
    D = C // num_heads
    scale = D ** (-0.5)
    hp = jax.lax.Precision.HIGHEST
    mean = x.mean(axis=(0, 1), keepdims=True)
    var = ((x - mean) ** 2).mean(axis=(0, 1), keepdims=True)
    xn = (x - mean) / jnp.sqrt(var + 1e-6)
    Q = cls_token.shape[0]
    q = jnp.broadcast_to(cls_token[None], (B, Q, C)).reshape(B, Q, num_heads, D)
    q = q.transpose(0, 2, 1, 3) * scale
    k = jnp.einsum('bnc,cd->bnd', xn, wk_t, precision=hp)
    k = k.reshape(B, N, num_heads, D).transpose(0, 2, 1, 3)
    v = jnp.einsum('bnc,cd->bnd', xn, wv_t, precision=hp)
    v = v.reshape(B, N, num_heads, D).transpose(0, 2, 1, 3)
    attn = jax.nn.softmax(
        jnp.einsum('bhqd,bhnd->bhqn', q, k, precision=hp), axis=-1)
    ctx = jnp.einsum('bhqn,bhnd->bhqd', attn, v, precision=hp)
    x_cls = ctx.transpose(0, 2, 1, 3).reshape(B, Q, C).mean(axis=1)
    out = jnp.einsum('bc,co->bo', x_cls, wl_t, precision=hp) + bl.reshape(-1)
    return out, x_cls


if __name__ == "__main__":
    B, N, C = 16, 16, 64          # batch, tokens, in_dim
    NUM_HEADS = 4                 # head_dim = 16
    NUM_QUERIES = 2
    OUT = 32                      # out_dim

    key = jax.random.PRNGKey(0)
    kx, kc, kk, kv, kw, kb = jax.random.split(key, 6)

    x = jax.random.normal(kx, (B, N, C), jnp.float32)
    cls_token = 0.02 * jax.random.normal(kc, (NUM_QUERIES, C), jnp.float32)
    # Linear weights stored pre-transposed: (in, out); qkv_bias=False.
    wk_t = 0.05 * jax.random.normal(kk, (C, C), jnp.float32)
    wv_t = 0.05 * jax.random.normal(kv, (C, C), jnp.float32)
    wl_t = 0.05 * jax.random.normal(kw, (C, OUT), jnp.float32)
    bl = 0.05 * jax.random.normal(kb, (1, OUT), jnp.float32)

    ref_out, ref_xcls = _reference(x, cls_token, wk_t, wv_t, wl_t, bl,
                                   num_heads=NUM_HEADS)

    # Tolerance for the f32-compute paths: covers the MXU's bf16-pass
    # decomposition of f32 matmuls under default precision.
    F32_TOL = dict(rtol=5e-3, atol=5e-3)

    # 1) Single-pass fused kernel (auto-selected: x fits comfortably in VMEM).
    out, x_cls = attention_pooling_classifier(
        x, cls_token, wk_t, wv_t, wl_t, bl, num_heads=NUM_HEADS)
    jax.block_until_ready((out, x_cls))
    assert out.shape == (B, OUT) and x_cls.shape == (B, C)
    assert jnp.allclose(out, ref_out, **F32_TOL)
    assert jnp.allclose(x_cls, ref_xcls, **F32_TOL)

    # 2) Two-pass path (parallel partial-stats kernel + BN folded into weights).
    out2, xcls2 = attention_pooling_classifier(
        x, cls_token, wk_t, wv_t, wl_t, bl, num_heads=NUM_HEADS,
        force_two_pass=True)
    jax.block_until_ready((out2, xcls2))
    assert out2.shape == (B, OUT) and xcls2.shape == (B, C)
    assert jnp.allclose(out2, ref_out, **F32_TOL)
    assert jnp.allclose(xcls2, ref_xcls, **F32_TOL)

    # 3) bf16 matmul operands (MXU-native on v5e/v6e/v7x); f32 softmax/BN.
    out_bf, xcls_bf = attention_pooling_classifier(
        x, cls_token, wk_t, wv_t, wl_t, bl, num_heads=NUM_HEADS,
        compute_dtype=jnp.bfloat16)
    jax.block_until_ready((out_bf, xcls_bf))
    assert jnp.allclose(out_bf, ref_out, rtol=2e-2, atol=2e-2)
    assert jnp.allclose(xcls_bf, ref_xcls, rtol=2e-2, atol=2e-2)

    print("KERNEL_OK")
</pallas_src>

<mosaic_0001>
module attributes {stable_mosaic.version = 11 : i64} {
  func.func @_fused_kernel(%arg0: i32, %arg1: memref<16x16x64xf32, #tpu.memory_space<vmem>>, %arg2: memref<64x128xf32, #tpu.memory_space<vmem>>, %arg3: memref<64x8xf32, #tpu.memory_space<vmem>>, %arg4: memref<8x128xf32, #tpu.memory_space<vmem>>, %arg5: memref<128x128xf32, #tpu.memory_space<vmem>>, %arg6: memref<1x128xf32, #tpu.memory_space<vmem>>, %arg7: memref<16x128xf32, #tpu.memory_space<vmem>>, %arg8: memref<16x128xf32, #tpu.memory_space<vmem>>) attributes {dimension_semantics = [#tpu.dimension_semantics<arbitrary>], iteration_bounds = array<i64: 1>, scalar_prefetch = 0 : i64, scratch_operands = 0 : i64, tpu.core_type = #tpu.core_type<tc>, window_params = [{pipeline_mode = #tpu.pipeline_mode<synchronous>, transform_indices = @transform_0, window_bounds = array<i64: 16, 16, 64>}, {pipeline_mode = #tpu.pipeline_mode<synchronous>, transform_indices = @transform_1, window_bounds = array<i64: 64, 128>}, {pipeline_mode = #tpu.pipeline_mode<synchronous>, transform_indices = @transform_2, window_bounds = array<i64: 64, 8>}, {pipeline_mode = #tpu.pipeline_mode<synchronous>, transform_indices = @transform_3, window_bounds = array<i64: 8, 128>}, {pipeline_mode = #tpu.pipeline_mode<synchronous>, transform_indices = @transform_4, window_bounds = array<i64: 128, 128>}, {pipeline_mode = #tpu.pipeline_mode<synchronous>, transform_indices = @transform_5, window_bounds = array<i64: 1, 128>}, {pipeline_mode = #tpu.pipeline_mode<synchronous>, transform_indices = @transform_6, window_bounds = array<i64: 16, 128>}, {pipeline_mode = #tpu.pipeline_mode<synchronous>, transform_indices = @transform_7, window_bounds = array<i64: 16, 128>}]} {
    %c0 = arith.constant 0 : index
    %c0_0 = arith.constant 0 : index
    %c0_1 = arith.constant 0 : index
    %0 = vector.load %arg1[%c0, %c0_0, %c0_1] : memref<16x16x64xf32, #tpu.memory_space<vmem>>, vector<16x16x64xf32>
    %1 = vector.shape_cast %0 : vector<16x16x64xf32> to vector<256x64xf32>
    %cst = arith.constant dense<0.000000e+00> : vector<64xf32>
    %2 = vector.multi_reduction <add>, %1, %cst [0] : vector<256x64xf32> to vector<64xf32>
    %3 = vector.shape_cast %2 : vector<64xf32> to vector<1x64xf32>
    %cst_2 = arith.constant 2.560000e+02 : f32
    %4 = vector.broadcast %cst_2 : f32 to vector<1x64xf32>
    %5 = arith.divf %3, %4 : vector<1x64xf32>
    %6 = vector.broadcast %5 : vector<1x64xf32> to vector<256x64xf32>
    %7 = arith.subf %1, %6 : vector<256x64xf32>
    %8 = arith.mulf %7, %7 : vector<256x64xf32>
    %cst_3 = arith.constant dense<0.000000e+00> : vector<64xf32>
    %9 = vector.multi_reduction <add>, %8, %cst_3 [0] : vector<256x64xf32> to vector<64xf32>
    %10 = vector.shape_cast %9 : vector<64xf32> to vector<1x64xf32>
    %cst_4 = arith.constant 2.560000e+02 : f32
    %11 = vector.broadcast %cst_4 : f32 to vector<1x64xf32>
    %12 = arith.divf %10, %11 : vector<1x64xf32>
    %cst_5 = arith.constant 9.99999997E-7 : f32
    %13 = vector.broadcast %cst_5 : f32 to vector<1x64xf32>
    %14 = arith.addf %12, %13 : vector<1x64xf32>
    %15 = math.rsqrt %14 : vector<1x64xf32>
    %16 = vector.broadcast %15 : vector<1x64xf32> to vector<256x64xf32>
    %17 = arith.mulf %7, %16 : vector<256x64xf32>
    %c0_6 = arith.constant 0 : index
    %c0_7 = arith.constant 0 : index
    %18 = vector.load %arg2[%c0_6, %c0_7] : memref<64x128xf32, #tpu.memory_space<vmem>>, vector<64x128xf32>
    %cst_8 = arith.constant dense<0.000000e+00> : vector<256x128xf32>
    %19 = tpu.matmul %17, %18, %cst_8 {dimension_numbers = #tpu.dot_dimension_numbers<[1], [0], [0], [1], [0, 0, 1, 1], [], []>} : vector<256x64xf32>, vector<64x128xf32>, vector<256x128xf32> -> vector<256x128xf32>
    %c0_9 = arith.constant 0 : index
    %c0_10 = arith.constant 0 : index
    %20 = vector.load %arg3[%c0_9, %c0_10] : memref<64x8xf32, #tpu.memory_space<vmem>>, vector<64x8xf32>
    %cst_11 = arith.constant dense<0.000000e+00> : vector<256x8xf32>
    %21 = tpu.matmul %17, %20, %cst_11 {dimension_numbers = #tpu.dot_dimension_numbers<[1], [0], [0], [1], [0, 0, 1, 1], [], []>} : vector<256x64xf32>, vector<64x8xf32>, vector<256x8xf32> -> vector<256x8xf32>
    %22 = vector.shape_cast %21 : vector<256x8xf32> to vector<16x16x8xf32>
    %cst_12 = arith.constant dense<0xFF800000> : vector<16x8xf32>
    %23 = vector.multi_reduction <maximumf>, %22, %cst_12 [1] : vector<16x16x8xf32> to vector<16x8xf32>
    %24 = vector.shape_cast %23 : vector<16x8xf32> to vector<16x1x8xf32>
    %25 = vector.broadcast %24 : vector<16x1x8xf32> to vector<16x16x8xf32>
    %26 = arith.subf %22, %25 : vector<16x16x8xf32>
    %27 = math.exp %26 : vector<16x16x8xf32>
    %cst_13 = arith.constant dense<0.000000e+00> : vector<16x8xf32>
    %28 = vector.multi_reduction <add>, %27, %cst_13 [1] : vector<16x16x8xf32> to vector<16x8xf32>
    %29 = vector.shape_cast %28 : vector<16x8xf32> to vector<16x1x8xf32>
    %30 = tpu.reciprocal %29 {approx = true} : vector<16x1x8xf32> -> vector<16x1x8xf32>
    %31 = arith.mulf %29, %30 : vector<16x1x8xf32>
    %cst_14 = arith.constant 2.000000e+00 : f32
    %32 = vector.broadcast %cst_14 : f32 to vector<16x1x8xf32>
    %33 = arith.subf %32, %31 : vector<16x1x8xf32>
    %34 = arith.mulf %30, %33 : vector<16x1x8xf32>
    %35 = vector.broadcast %34 : vector<16x1x8xf32> to vector<16x16x8xf32>
    %36 = arith.mulf %27, %35 : vector<16x16x8xf32>
    %37 = vector.shape_cast %36 : vector<16x16x8xf32> to vector<256x8xf32>
    %c0_15 = arith.constant 0 : index
    %c0_16 = arith.constant 0 : index
    %38 = vector.load %arg4[%c0_15, %c0_16] : memref<8x128xf32, #tpu.memory_space<vmem>>, vector<8x128xf32>
    %cst_17 = arith.constant dense<0.000000e+00> : vector<256x128xf32>
    %39 = tpu.matmul %37, %38, %cst_17 {dimension_numbers = #tpu.dot_dimension_numbers<[1], [0], [0], [1], [0, 0, 1, 1], [], []>} : vector<256x8xf32>, vector<8x128xf32>, vector<256x128xf32> -> vector<256x128xf32>
    %40 = arith.mulf %39, %19 : vector<256x128xf32>
    %41 = vector.shape_cast %40 : vector<256x128xf32> to vector<16x16x128xf32>
    %cst_18 = arith.constant dense<0.000000e+00> : vector<16x128xf32>
    %42 = vector.multi_reduction <add>, %41, %cst_18 [1] : vector<16x16x128xf32> to vector<16x128xf32>
    %c0_19 = arith.constant 0 : index
    %c0_20 = arith.constant 0 : index
    %43 = vector.load %arg5[%c0_19, %c0_20] : memref<128x128xf32, #tpu.memory_space<vmem>>, vector<128x128xf32>
    %cst_21 = arith.constant dense<0.000000e+00> : vector<16x128xf32>
    %44 = tpu.matmul %42, %43, %cst_21 {dimension_numbers = #tpu.dot_dimension_numbers<[1], [0], [0], [1], [0, 0, 1, 1], [], []>} : vector<16x128xf32>, vector<128x128xf32>, vector<16x128xf32> -> vector<16x128xf32>
    %c0_22 = arith.constant 0 : index
    %c0_23 = arith.constant 0 : index
    %45 = vector.load %arg6[%c0_22, %c0_23] : memref<1x128xf32, #tpu.memory_space<vmem>>, vector<1x128xf32>
    %46 = vector.broadcast %45 : vector<1x128xf32> to vector<16x128xf32>
    %47 = arith.addf %44, %46 : vector<16x128xf32>
    %c0_24 = arith.constant 0 : index
    %c0_25 = arith.constant 0 : index
    %48 = vector.load %arg8[%c0_24, %c0_25] : memref<16x128xf32, #tpu.memory_space<vmem>>, vector<16x128xf32>
    tpu.vector_store %arg8[%c0_24, %c0_25], %42 {strides = array<i32>} : memref<16x128xf32, #tpu.memory_space<vmem>>, vector<16x128xf32>,
    %c0_26 = arith.constant 0 : index
    %c0_27 = arith.constant 0 : index
    %49 = vector.load %arg7[%c0_26, %c0_27] : memref<16x128xf32, #tpu.memory_space<vmem>>, vector<16x128xf32>
    tpu.vector_store %arg7[%c0_26, %c0_27], %47 {strides = array<i32>} : memref<16x128xf32, #tpu.memory_space<vmem>>, vector<16x128xf32>,
    return
  }
  func.func @transform_0(%arg0: i32) -> (i32, i32, i32) {
    %c0_i32 = arith.constant 0 : i32
    %c0_i32_0 = arith.constant 0 : i32
    %c0_i32_1 = arith.constant 0 : i32
    %c0_i32_2 = arith.constant 0 : i32
    return %c0_i32, %c0_i32_0, %c0_i32_1 : i32, i32, i32
  }
  func.func @transform_1(%arg0: i32) -> (i32, i32) {
    %c0_i32 = arith.constant 0 : i32
    %c0_i32_0 = arith.constant 0 : i32
    %c0_i32_1 = arith.constant 0 : i32
    return %c0_i32, %c0_i32_0 : i32, i32
  }
  func.func @transform_2(%arg0: i32) -> (i32, i32) {
    %c0_i32 = arith.constant 0 : i32
    %c0_i32_0 = arith.constant 0 : i32
    %c0_i32_1 = arith.constant 0 : i32
    return %c0_i32, %c0_i32_0 : i32, i32
  }
  func.func @transform_3(%arg0: i32) -> (i32, i32) {
    %c0_i32 = arith.constant 0 : i32
    %c0_i32_0 = arith.constant 0 : i32
    %c0_i32_1 = arith.constant 0 : i32
    return %c0_i32, %c0_i32_0 : i32, i32
  }
  func.func @transform_4(%arg0: i32) -> (i32, i32) {
    %c0_i32 = arith.constant 0 : i32
    %c0_i32_0 = arith.constant 0 : i32
    %c0_i32_1 = arith.constant 0 : i32
    return %c0_i32, %c0_i32_0 : i32, i32
  }
  func.func @transform_5(%arg0: i32) -> (i32, i32) {
    %c0_i32 = arith.constant 0 : i32
    %c0_i32_0 = arith.constant 0 : i32
    %c0_i32_1 = arith.constant 0 : i32
    return %c0_i32, %c0_i32_0 : i32, i32
  }
  func.func @transform_6(%arg0: i32) -> (i32, i32) {
    %c0_i32 = arith.constant 0 : i32
    %c0_i32_0 = arith.constant 0 : i32
    %c0_i32_1 = arith.constant 0 : i32
    return %c0_i32, %c0_i32_0 : i32, i32
  }
  func.func @transform_7(%arg0: i32) -> (i32, i32) {
    %c0_i32 = arith.constant 0 : i32
    %c0_i32_0 = arith.constant 0 : i32
    %c0_i32_1 = arith.constant 0 : i32
    return %c0_i32, %c0_i32_0 : i32, i32
  }
}

</mosaic_0001>

<bundles_post_ra>
// kernel: tpu_custom_call.1
= control target key start
LH: loop header
LB: loop body
LE: loop exit
PB: predicated region body
PF: predicated region fallthrough
CT: control target
= control target key end

     0   :  { %13 = vsyncpa [#allocation3], 0  ;;  %s3838_s0 = inlined_call_operand.hbm [shape: f32[16,16,64], index: 0, kind: input, shape index: {}]   ;;  %s3839_s1 = inlined_call_operand.vmem [shape: f32[64,128], index: 1, kind: input, shape index: {}]   ;;  %s3840_s2 = inlined_call_operand.vmem [shape: f32[64,8], index: 2, kind: input, shape index: {}]   ;;  %s3841_s3 = inlined_call_operand.vmem [shape: f32[8,128], index: 3, kind: input, shape index: {}]   ;;  %s3842_s4 = inlined_call_operand.hbm [shape: f32[128,128], index: 4, kind: input, shape index: {}]   ;;  %s3843_s5 = inlined_call_operand.vmem [shape: f32[1,128], index: 5, kind: input, shape index: {}]   ;;  %s3844_s6 = inlined_call_operand.hbm [shape: f32[16,128], index: 6, kind: output, shape index: {0}]   ;;  %s3845_s7 = inlined_call_operand.hbm [shape: f32[16,128], index: 7, kind: output, shape index: {1}]  }
   0x1   :  { %14 = vsyncpa [#allocation6], 0 }
   0x2   :  { %15 = vsyncpa [#allocation4], 0 }
   0x3   :  { %16 = vsyncpa [#allocation9], 0  ;;  %s2660_s24 = smov [#allocation2]  }
   0x4   :  { %s22_s25 = sshll.u32 %s2660_s24, 4  ;;  %s23_s25 = int_to_ptr.vmem [resolvable:$true] %s22_s25 }
   0x5   :  { %s2580_s26 = scalar_lea.vmem %s23_s25, 4096  ;;  %p2585_p1 = scmp.lt.s32.totalorder %s23_s25, %s23_s25 }
   0x6   :  { %p2581_p0 = scmp.ne.s32.totalorder %s23_s25, %s2580_s26  ;;  %p2586_p2 = scmp.lt.s32.totalorder %s2580_s26, %s2580_s26 }
   0x8   :  { %p2587_p3 = por %p2586_p2, %p2585_p1 }
   0xa   :  { %p2588_p4 = pnand %p2587_p3, %p2581_p0 }
   0xc   :  { %2591 = shalt.err (!%p2588_p4)
}
   0xd   :  { %s2661_s27 = smov 128   ;;  %s2662_s28 = smov 8  }
   0xe   :  { %28 = dma.hbm_to_vmem [thread:$0]  %s3838_s0, 4096, %s23_s25, [#allocation3], %s2661_s27, %s2661_s27, %s2662_s28  }
   0xf   :  { %s2663_s8 = smov [#allocation5]  }
  0x10   :  { %s40_s9 = sshll.u32 %s2663_s8, 4  ;;  %s41_s9 = int_to_ptr.vmem [resolvable:$true] %s40_s9 }
  0x11   :  { %s2600_s10 = scalar_lea.vmem %s41_s9, 2048  ;;  %p2605_p6 = scmp.lt.s32.totalorder %s41_s9, %s41_s9 }
  0x12   :  { %p2601_p5 = scmp.ne.s32.totalorder %s41_s9, %s2600_s10  ;;  %p2606_p7 = scmp.lt.s32.totalorder %s2600_s10, %s2600_s10 }
  0x14   :  { %p2607_p8 = por %p2606_p7, %p2605_p6 }
  0x16   :  { %p2608_p9 = pnand %p2607_p8, %p2601_p5 }
  0x18   :  { %2611 = shalt.err (!%p2608_p9)
}
  0x19   :  { %46 = dma.hbm_to_vmem [thread:$0]  %s3842_s4, 2048, %s41_s9, [#allocation6], %s2661_s27, %s2661_s27, %s2662_s28  }
  0x1a   :  { %2652 = dma.done.wait [#allocation3], 4096  }
  0x1b   :  { %2653 = vsyncadd [#allocation3], 4294963200 }
  0x1c   :  { %2654 = dma.done.wait [#allocation6], 2048  }
  0x1d   :  { %2655 = vsyncadd [#allocation6], 4294965248  ;;  %v334_v0 = vld [vmem:[%s3839_s1 + $0x38] sm:$0xff]  ;;  %v333_v1 = vld [vmem:[%s3839_s1 + $0x30] sm:$0xff]  ;;  %vm87_vm0 = vcmask 523264   ;;  %vm889_vm1 = vcmask 64512  }
  0x1e   :  { %2452 = vmatprep.subr.mxu1 %v334_v0  ;;  %2239 = vmatprep.subr.mxu0 %v334_v0  ;;  %v332_v2 = vld [vmem:[%s3839_s1 + $0x28] sm:$0xff]  ;;  %v2727_v3 = vld [vmem:[#allocation2] sm:$0xff]  ;;  %v2731_v5 = vld [vmem:[#allocation2 + $0x10] sm:$0xff]  ;;  %vm1875_vm2 = vcmask 1041409   ;;  %vm1877_vm3 = vcmask 1042434   ;;  %vm1879_vm4 = vcmask 1043459  }
  0x1f   :  { %2460 = vmatpush3.msra.mxu1 %v334_v0  ;;  %2240 = vmatpush3.msra.mxu0 %v334_v0  ;;  %v2729_v4 = vld [vmem:[#allocation2 + $0x8] sm:$0xff]  ;;  %v2733_v6 = vld [vmem:[#allocation2 + $0x18] sm:$0xff]  ;;  %v88_v7 = vsel %vm87_vm0, %v2727_v3, 0.0  ;;  %v331_v8 = vld [vmem:[%s3839_s1 + $0x20] sm:$0xff]  ;;  %v91_v10 = vsel %vm87_vm0, %v2731_v5, 0.0  ;;  %vm1881_vm5 = vcmask 1044484  }
  0x20   :  { %2453 = vmatprep.subr.mxu1 %v333_v1  ;;  %2241 = vmatprep.subr.mxu0 %v333_v1  ;;  %v89_v9 = vsel %vm87_vm0, %v2729_v4, 0.0  ;;  %v2744_v11 = vld [vmem:[#allocation2 + $0x20] sm:$0xff]  ;;  %v330_v13 = vld [vmem:[%s3839_s1 + $0x18] sm:$0xff]  ;;  %v93_v14 = vsel %vm87_vm0, %v2733_v6, 0.0  ;;  %v2751_v15 = vld [vmem:[#allocation2 + $0x28] sm:$0xff]  ;;  %vm1883_vm6 = vcmask 1045509  }
  0x21   :  { %2461 = vmatpush3.msra.mxu1 %v333_v1  ;;  %2242 = vmatpush3.msra.mxu0 %v333_v1  ;;  %v90_v12 = vadd.f32 %v89_v9, %v88_v7  ;;  %v329_v17 = vld [vmem:[%s3839_s1 + $0x10] sm:$0xff]  ;;  %v95_v18 = vsel %vm87_vm0, %v2744_v11, 0.0  ;;  %v328_v21 = vld [vmem:[%s3839_s1 + $0x8] sm:$0xff]  ;;  %v97_v22 = vsel %vm87_vm0, %v2751_v15, 0.0  ;;  %v2765_v23 = vld [vmem:[#allocation2 + $0x38] sm:$0xff]  ;;  %vm1885_vm7 = vcmask 1046534  }
  0x22   :  { %2454 = vmatprep.subr.mxu1 %v332_v2  ;;  %2243 = vmatprep.subr.mxu0 %v332_v2  ;;  %v2758_v19 = vld [vmem:[#allocation2 + $0x30] sm:$0xff]  ;;  %v327_v25 = vld [vmem:[%s3839_s1] sm:$0xff]  ;;  %v101_v29 = vsel %vm87_vm0, %v2765_v23, 0.0  ;;  %v2776_v30 = vld [vmem:[#allocation2 + $0x48] sm:$0xff]  ;;  %vm1887_vm8 = vcmask 1047559  }
  0x23   :  { %2462 = vmatpush3.msra.mxu1 %v332_v2  ;;  %2244 = vmatpush3.msra.mxu0 %v332_v2  ;;  %v92_v16 = vadd.f32 %v91_v10, %v90_v12  ;;  %v99_v26 = vsel %vm87_vm0, %v2758_v19, 0.0  ;;  %v2772_v27 = vld [vmem:[#allocation2 + $0x40] sm:$0xff]  ;;  %v2780_v33 = vld [vmem:[#allocation2 + $0x50] sm:$0xff]  ;;  %v105_v35 = vsel %vm87_vm0, %v2776_v30, 0.0  ;;  %v2784_v36 = vld [vmem:[#allocation2 + $0x58] sm:$0xff] }
  0x24   :  { %2455 = vmatprep.subr.mxu1 %v331_v8  ;;  %2245 = vmatprep.subr.mxu0 %v331_v8  ;;  %v103_v32 = vsel %vm87_vm0, %v2772_v27, 0.0  ;;  %v107_v38 = vsel %vm87_vm0, %v2780_v33, 0.0  ;;  %v2788_v39 = vld [vmem:[#allocation2 + $0x60] sm:$0xff]  ;;  %v109_v41 = vsel %vm87_vm0, %v2784_v36, 0.0  ;;  %v2792_v42 = vld [vmem:[#allocation2 + $0x68] sm:$0xff]  ;;  %v2796_v45 = vld [vmem:[#allocation2 + $0x70] sm:$0xff] }
  0x25   :  { %2463 = vmatpush3.msra.mxu1 %v331_v8  ;;  %2246 = vmatpush3.msra.mxu0 %v331_v8  ;;  %v94_v20 = vadd.f32 %v93_v14, %v92_v16  ;;  %v111_v44 = vsel %vm87_vm0, %v2788_v39, 0.0  ;;  %v113_v47 = vsel %vm87_vm0, %v2792_v42, 0.0  ;;  %v2800_v48 = vld [vmem:[#allocation2 + $0x78] sm:$0xff]  ;;  %v115_v50 = vsel %vm87_vm0, %v2796_v45, 0.0  ;;  %v2804_v51 = vld [vmem:[#allocation2 + $0x80] sm:$0xff]  ;;  %v2808_v54 = vld [vmem:[#allocation2 + $0x88] sm:$0xff] }
  0x26   :  { %2456 = vmatprep.subr.mxu1 %v330_v13  ;;  %2247 = vmatprep.subr.mxu0 %v330_v13  ;;  %v117_v53 = vsel %vm87_vm0, %v2800_v48, 0.0  ;;  %v119_v56 = vsel %vm87_vm0, %v2804_v51, 0.0  ;;  %v2812_v57 = vld [vmem:[#allocation2 + $0x90] sm:$0xff]  ;;  %v121_v59 = vsel %vm87_vm0, %v2808_v54, 0.0  ;;  %v2816_v60 = vld [vmem:[#allocation2 + $0x98] sm:$0xff]  ;;  %v2820_v63 = vld [vmem:[#allocation2 + $0xa0] sm:$0xff] }
  0x27   :  { %2464 = vmatpush3.msra.mxu1 %v330_v13  ;;  %2248 = vmatpush3.msra.mxu0 %v330_v13  ;;  %v96_v24 = vadd.f32 %v95_v18, %v94_v20  ;;  %v123_v62 = vsel %vm87_vm0, %v2812_v57, 0.0  ;;  %v125_v1 = vsel %vm87_vm0, %v2816_v60, 0.0  ;;  %v2824_v2 = vld [vmem:[#allocation2 + $0xa8] sm:$0xff]  ;;  %v127_v8 = vsel %vm87_vm0, %v2820_v63, 0.0  ;;  %v2828_v9 = vld [vmem:[#allocation2 + $0xb0] sm:$0xff]  ;;  %v2832_v13 = vld [vmem:[#allocation2 + $0xb8] sm:$0xff] }
  0x28   :  { %2457 = vmatprep.subr.mxu1 %v329_v17  ;;  %2249 = vmatprep.subr.mxu0 %v329_v17  ;;  %v129_v12 = vsel %vm87_vm0, %v2824_v2, 0.0  ;;  %v131_v16 = vsel %vm87_vm0, %v2828_v9, 0.0  ;;  %v133_v20 = vsel %vm87_vm0, %v2832_v13, 0.0 }
  0x29   :  { %2465 = vmatpush3.msra.mxu1 %v329_v17  ;;  %2250 = vmatpush3.msra.mxu0 %v329_v17  ;;  %v98_v28 = vadd.f32 %v97_v22, %v96_v24  ;;  %v2836_v17 = vld [vmem:[#allocation2 + $0xc0] sm:$0xff] }
  0x2a   :  { %2458 = vmatprep.subr.mxu1 %v328_v21  ;;  %2251 = vmatprep.subr.mxu0 %v328_v21  ;;  %v135_v24 = vsel %vm87_vm0, %v2836_v17, 0.0 }
  0x2b   :  { %2466 = vmatpush3.msra.mxu1 %v328_v21  ;;  %2252 = vmatpush3.msra.mxu0 %v328_v21  ;;  %v100_v31 = vadd.f32 %v99_v26, %v98_v28  ;;  %v2840_v21 = vld [vmem:[#allocation2 + $0xc8] sm:$0xff] }
  0x2c   :  { %2459 = vmatprep.subr.mxu1 %v327_v25  ;;  %2253 = vmatprep.subr.mxu0 %v327_v25  ;;  %v137_v28 = vsel %vm87_vm0, %v2840_v21, 0.0 }
  0x2d   :  { %2467 = vmatpush3.msra.mxu1 %v327_v25  ;;  %2254 = vmatpush3.msra.mxu0 %v327_v25  ;;  %v102_v34 = vadd.f32 %v101_v29, %v100_v31  ;;  %v2844_v25 = vld [vmem:[#allocation2 + $0xd0] sm:$0xff]  ;;  %v2848_v29 = vld [vmem:[#allocation2 + $0xd8] sm:$0xff] }
  0x2f   :  { %v104_v37 = vadd.f32 %v103_v32, %v102_v34  ;;  %v139_v32 = vsel %vm87_vm0, %v2844_v25, 0.0  ;;  %v2852_v34 = vld [vmem:[#allocation2 + $0xe0] sm:$0xff] }
  0x31   :  { %v106_v40 = vadd.f32 %v105_v35, %v104_v37  ;;  %v141_v37 = vsel %vm87_vm0, %v2848_v29, 0.0 }
  0x33   :  { %v108_v43 = vadd.f32 %v107_v38, %v106_v40  ;;  %v2856_v38 = vld [vmem:[#allocation2 + $0xe8] sm:$0xff] }
  0x35   :  { %v110_v46 = vadd.f32 %v109_v41, %v108_v43  ;;  %v143_v41 = vsel %vm87_vm0, %v2852_v34, 0.0  ;;  %v2860_v43 = vld [vmem:[#allocation2 + $0xf0] sm:$0xff] }
  0x37   :  { %v112_v49 = vadd.f32 %v111_v44, %v110_v46  ;;  %v145_v46 = vsel %vm87_vm0, %v2856_v38, 0.0 }
  0x39   :  { %v114_v52 = vadd.f32 %v113_v47, %v112_v49  ;;  %v2864_v47 = vld [vmem:[#allocation2 + $0xf8] sm:$0xff] }
  0x3b   :  { %v116_v55 = vadd.f32 %v115_v50, %v114_v52  ;;  %v147_v50 = vsel %vm87_vm0, %v2860_v43, 0.0 }
  0x3d   :  { %v118_v58 = vadd.f32 %v117_v53, %v116_v55  ;;  %v149_v53 = vsel %vm87_vm0, %v2864_v47, 0.0 }
  0x3f   :  { %v120_v61 = vadd.f32 %v119_v56, %v118_v58  ;;  %v2873_v56 = vld [vmem:[%s3840_s2 + $0x38] sm:$0xff] }
  0x40   :  { %2303 = vmatprep.subr.mxu1 %v2873_v56 }
  0x41   :  { %v122_v0 = vadd.f32 %v121_v59, %v120_v61 }
  0x43   :  { %v124_v7 = vadd.f32 %v123_v62, %v122_v0 }
  0x45   :  { %v126_v10 = vadd.f32 %v125_v1, %v124_v7 }
  0x47   :  { %v128_v14 = vadd.f32 %v127_v8, %v126_v10 }
  0x49   :  { %v130_v18 = vadd.f32 %v129_v12, %v128_v14 }
  0x4b   :  { %v132_v22 = vadd.f32 %v131_v16, %v130_v18 }
  0x4d   :  { %v134_v26 = vadd.f32 %v133_v20, %v132_v22 }
  0x4f   :  { %v136_v31 = vadd.f32 %v135_v24, %v134_v26 }
  0x51   :  { %v138_v35 = vadd.f32 %v137_v28, %v136_v31 }
  0x53   :  { %v140_v40 = vadd.f32 %v139_v32, %v138_v35 }
  0x55   :  { %v142_v44 = vadd.f32 %v141_v37, %v140_v40 }
  0x57   :  { %v144_v49 = vadd.f32 %v143_v41, %v142_v44 }
  0x59   :  { %v146_v52 = vadd.f32 %v145_v46, %v144_v49 }
  0x5b   :  { %v148_v55 = vadd.f32 %v147_v50, %v146_v52 }
  0x5d   :  { %v150_v58 = vadd.f32 %v149_v53, %v148_v55 }
  0x5f   :  { %v151_v59 = vrot.slane %v150_v58, 4 }
  0x61   :  { %v152_v61 = vadd.f32 %v151_v59, %v150_v58 }
  0x63   :  { %v153_v62 = vrot.slane %v152_v61, 2 }
  0x65   :  { %v154_v0 = vadd.f32 %v153_v62, %v152_v61 }
  0x67   :  { %v155_v1 = vrot.slane %v154_v0, 1 }
  0x69   :  { %v156_v7 = vadd.f32 %v155_v1, %v154_v0 }
  0x6b   :  { %v2876_v8 = vmul.f32 0.00390625, %v156_v7 }
  0x6d   :  { %v2880_v10 = vsub.f32 %v2727_v3, %v2876_v8  ;;  %v2884_v12 = vsub.f32 %v2729_v4, %v2876_v8  ;;  %v2888_v14 = vsub.f32 %v2731_v5, %v2876_v8  ;;  %v2892_v16 = vsub.f32 %v2733_v6, %v2876_v8 }
  0x6e   :  { %v2896_v18 = vsub.f32 %v2744_v11, %v2876_v8  ;;  %v2906_v5 = vsub.f32 %v2751_v15, %v2876_v8  ;;  %v2912_v11 = vsub.f32 %v2758_v19, %v2876_v8  ;;  %v2921_v15 = vsub.f32 %v2765_v23, %v2876_v8 }
  0x6f   :  { %v191_v3 = vmul.f32 %v2880_v10, %v2880_v10  ;;  %v192_v20 = vmul.f32 %v2884_v12, %v2884_v12  ;;  %v193_v4 = vmul.f32 %v2888_v14, %v2888_v14  ;;  %v194_v6 = vmul.f32 %v2892_v16, %v2892_v16 }
  0x70   :  { %v195_v22 = vmul.f32 %v2896_v18, %v2896_v18  ;;  %v196_v32 = vmul.f32 %v2906_v5, %v2906_v5  ;;  %v2928_v37 = vsub.f32 %v2772_v27, %v2876_v8  ;;  %v197_v40 = vmul.f32 %v2912_v11, %v2912_v11 }
  0x71   :  { %v223_v24 = vsel %vm87_vm0, %v191_v3, 0.0  ;;  %v224_v26 = vsel %vm87_vm0, %v192_v20, 0.0  ;;  %v226_v28 = vsel %vm87_vm0, %v193_v4, 0.0  ;;  %v228_v19 = vsel %vm87_vm0, %v194_v6, 0.0 }
  0x72   :  { %v225_v31 = vadd.f32 %v224_v26, %v223_v24  ;;  %v230_v41 = vsel %vm87_vm0, %v195_v22, 0.0  ;;  %v2935_v23 = vsub.f32 %v2776_v30, %v2876_v8  ;;  %v198_v46 = vmul.f32 %v2921_v15, %v2921_v15 }
  0x73   :  { %v232_v49 = vsel %vm87_vm0, %v196_v32, 0.0  ;;  %v2942_v27 = vsub.f32 %v2780_v33, %v2876_v8  ;;  %v199_v52 = vmul.f32 %v2928_v37, %v2928_v37  ;;  %v234_v53 = vsel %vm87_vm0, %v197_v40, 0.0 }
  0x74   :  { %v227_v35 = vadd.f32 %v226_v28, %v225_v31  ;;  %v2949_v30 = vsub.f32 %v2784_v36, %v2876_v8  ;;  %v200_v58 = vmul.f32 %v2935_v23, %v2935_v23  ;;  %v236_v59 = vsel %vm87_vm0, %v198_v46, 0.0 }
  0x75   :  { %v2956_v33 = vsub.f32 %v2788_v39, %v2876_v8  ;;  %v201_v62 = vmul.f32 %v2942_v27, %v2942_v27  ;;  %v238_v0 = vsel %vm87_vm0, %v199_v52, 0.0  ;;  %v2963_v36 = vsub.f32 %v2792_v42, %v2876_v8 }
  0x76   :  { %v229_v44 = vadd.f32 %v228_v19, %v227_v35  ;;  %v202_v7 = vmul.f32 %v2949_v30, %v2949_v30  ;;  %v240_v3 = vsel %vm87_vm0, %v200_v58, 0.0  ;;  %v2970_v39 = vsub.f32 %v2796_v45, %v2876_v8 }
  0x77   :  { %v203_v4 = vmul.f32 %v2956_v33, %v2956_v33  ;;  %v242_v6 = vsel %vm87_vm0, %v201_v62, 0.0  ;;  %v2977_v42 = vsub.f32 %v2800_v48, %v2876_v8  ;;  %v204_v24 = vmul.f32 %v2963_v36, %v2963_v36 }
  0x78   :  { %v231_v50 = vadd.f32 %v230_v41, %v229_v44  ;;  %v244_v26 = vsel %vm87_vm0, %v202_v7, 0.0  ;;  %v2984_v45 = vsub.f32 %v2804_v51, %v2876_v8  ;;  %v205_v31 = vmul.f32 %v2970_v39, %v2970_v39 }
  0x79   :  { %v246_v32 = vsel %vm87_vm0, %v203_v4, 0.0  ;;  %v2991_v48 = vsub.f32 %v2808_v54, %v2876_v8  ;;  %v206_v35 = vmul.f32 %v2977_v42, %v2977_v42  ;;  %v248_v40 = vsel %vm87_vm0, %v204_v24, 0.0 }
  0x7a   :  { %v233_v55 = vadd.f32 %v232_v49, %v231_v50  ;;  %v2998_v51 = vsub.f32 %v2812_v57, %v2876_v8  ;;  %v207_v44 = vmul.f32 %v2984_v45, %v2984_v45  ;;  %v250_v46 = vsel %vm87_vm0, %v205_v31, 0.0 }
  0x7b   :  { %v3005_v54 = vsub.f32 %v2816_v60, %v2876_v8  ;;  %v208_v50 = vmul.f32 %v2991_v48, %v2991_v48  ;;  %v252_v52 = vsel %vm87_vm0, %v206_v35, 0.0  ;;  %v3012_v57 = vsub.f32 %v2820_v63, %v2876_v8 }
  0x7c   :  { %v235_v61 = vadd.f32 %v234_v53, %v233_v55  ;;  %v209_v55 = vmul.f32 %v2998_v51, %v2998_v51  ;;  %v254_v58 = vsel %vm87_vm0, %v207_v44, 0.0  ;;  %v3019_v60 = vsub.f32 %v2824_v2, %v2876_v8 }
  0x7d   :  { %v256_v62 = vsel %vm87_vm0, %v208_v50, 0.0  ;;  %v3026_v63 = vsub.f32 %v2828_v9, %v2876_v8  ;;  %v3033_v2 = vsub.f32 %v2832_v13, %v2876_v8  ;;  %v3040_v9 = vsub.f32 %v2836_v17, %v2876_v8 }
  0x7e   :  { %v237_v1 = vadd.f32 %v236_v59, %v235_v61  ;;  %v210_v61 = vmul.f32 %v3005_v54, %v3005_v54  ;;  %v258_v7 = vsel %vm87_vm0, %v209_v55, 0.0  ;;  %v3047_v13 = vsub.f32 %v2840_v21, %v2876_v8 }
  0x7f   :  { %v3054_v17 = vsub.f32 %v2844_v25, %v2876_v8  ;;  %v3061_v21 = vsub.f32 %v2848_v29, %v2876_v8  ;;  %v3068_v25 = vsub.f32 %v2852_v34, %v2876_v8  ;;  %v3075_v29 = vsub.f32 %v2856_v38, %v2876_v8 }
  0x80   :  { %v239_v20 = vadd.f32 %v238_v0, %v237_v1  ;;  %v211_v1 = vmul.f32 %v3012_v57, %v3012_v57  ;;  %v260_v4 = vsel %vm87_vm0, %v210_v61, 0.0  ;;  %v3082_v34 = vsub.f32 %v2860_v43, %v2876_v8 }
  0x81   :  { %v3089_v38 = vsub.f32 %v2864_v47, %v2876_v8 }
  0x82   :  { %v241_v22 = vadd.f32 %v240_v3, %v239_v20  ;;  %v212_v20 = vmul.f32 %v3019_v60, %v3019_v60  ;;  %v262_v24 = vsel %vm87_vm0, %v211_v1, 0.0  ;;  %v221_v43 = vmul.f32 %v3082_v34, %v3082_v34 }
  0x84   :  { %v243_v28 = vadd.f32 %v242_v6, %v241_v22  ;;  %v213_v22 = vmul.f32 %v3026_v63, %v3026_v63  ;;  %v264_v31 = vsel %vm87_vm0, %v212_v20, 0.0  ;;  %v282_v47 = vsel %vm87_vm0, %v221_v43, 0.0 }
  0x86   :  { %v245_v19 = vadd.f32 %v244_v26, %v243_v28  ;;  %v214_v28 = vmul.f32 %v3033_v2, %v3033_v2  ;;  %v266_v35 = vsel %vm87_vm0, %v213_v22, 0.0 }
  0x88   :  { %v247_v41 = vadd.f32 %v246_v32, %v245_v19  ;;  %v215_v19 = vmul.f32 %v3040_v9, %v3040_v9  ;;  %v268_v44 = vsel %vm87_vm0, %v214_v28, 0.0 }
  0x8a   :  { %v249_v49 = vadd.f32 %v248_v40, %v247_v41  ;;  %v216_v41 = vmul.f32 %v3047_v13, %v3047_v13  ;;  %v270_v50 = vsel %vm87_vm0, %v215_v19, 0.0 }
  0x8c   :  { %v251_v53 = vadd.f32 %v250_v46, %v249_v49  ;;  %v217_v49 = vmul.f32 %v3054_v17, %v3054_v17  ;;  %v272_v55 = vsel %vm87_vm0, %v216_v41, 0.0 }
  0x8e   :  { %v253_v59 = vadd.f32 %v252_v52, %v251_v53  ;;  %v218_v53 = vmul.f32 %v3061_v21, %v3061_v21  ;;  %v274_v61 = vsel %vm87_vm0, %v217_v49, 0.0 }
  0x90   :  { %v255_v0 = vadd.f32 %v254_v58, %v253_v59  ;;  %v219_v59 = vmul.f32 %v3068_v25, %v3068_v25  ;;  %v276_v1 = vsel %vm87_vm0, %v218_v53, 0.0 }
  0x92   :  { %v257_v3 = vadd.f32 %v256_v62, %v255_v0  ;;  %v220_v0 = vmul.f32 %v3075_v29, %v3075_v29 }
  0x94   :  { %v259_v6 = vadd.f32 %v258_v7, %v257_v3  ;;  %v278_v3 = vsel %vm87_vm0, %v219_v59, 0.0  ;;  %v659_v59 = vld [vmem:[%s3840_s2 + $0x18] sm:$0xff] }
  0x96   :  { %v261_v26 = vadd.f32 %v260_v4, %v259_v6  ;;  %v222_v4 = vmul.f32 %v3089_v38, %v3089_v38  ;;  %v280_v6 = vsel %vm87_vm0, %v220_v0, 0.0 }
  0x98   :  { %v263_v32 = vadd.f32 %v262_v24, %v261_v26  ;;  %v284_v24 = vsel %vm87_vm0, %v222_v4, 0.0 }
  0x9a   :  { %v265_v40 = vadd.f32 %v264_v31, %v263_v32 }
  0x9c   :  { %v267_v46 = vadd.f32 %v266_v35, %v265_v40 }
  0x9e   :  { %v269_v52 = vadd.f32 %v268_v44, %v267_v46 }
  0xa0   :  { %v271_v58 = vadd.f32 %v270_v50, %v269_v52 }
  0xa2   :  { %v273_v62 = vadd.f32 %v272_v55, %v271_v58  ;;  %v662_v55 = vld [vmem:[%s3840_s2 + $0x30] sm:$0xff] }
  0xa4   :  { %v275_v7 = vadd.f32 %v274_v61, %v273_v62  ;;  %v657_v62 = vld [vmem:[%s3840_s2 + $0x8] sm:$0xff] }
  0xa6   :  { %v277_v20 = vadd.f32 %v276_v1, %v275_v7 }
  0xa8   :  { %v279_v22 = vadd.f32 %v278_v3, %v277_v20 }
  0xaa   :  { %v281_v8 = vadd.f32 %v280_v6, %v279_v22 }
  0xac   :  { %v283_v26 = vadd.f32 %v282_v47, %v281_v8 }
  0xae   :  { %v285_v28 = vadd.f32 %v284_v24, %v283_v26 }
  0xb0   :  { %v286_v31 = vrot.slane %v285_v28, 4 }
  0xb2   :  { %v287_v32 = vadd.f32 %v286_v31, %v285_v28 }
  0xb4   :  { %v288_v19 = vrot.slane %v287_v32, 2 }
  0xb6   :  { %v289_v35 = vadd.f32 %v288_v19, %v287_v32 }
  0xb8   :  { %v290_v40 = vrot.slane %v289_v35, 1 }
  0xba   :  { %v291_v41 = vadd.f32 %v290_v40, %v289_v35 }
  0xbc   :  { %v292_v44 = vmul.f32 0.00390625, %v291_v41 }
  0xbe   :  { %v293_v46 = vadd.f32 1e-06, %v292_v44 }
  0xc0   :  { %2474 = vrsqrt.f32 %v293_v46 }
  0xcd   :  { %v3102_v49 = vpop.eup %2474 }
  0xce   :  { %v3106_v50 = vmul.f32 %v3102_v49, %v2998_v51  ;;  %v3110_v52 = vmul.f32 %v3102_v49, %v3005_v54  ;;  %v3114_v53 = vmul.f32 %v3102_v49, %v3012_v57  ;;  %v3125_v51 = vmul.f32 %v3102_v49, %v3019_v60  ;;  %v661_v54 = vld [vmem:[%s3840_s2 + $0x28] sm:$0xff]  ;;  %v660_v60 = vld [vmem:[%s3840_s2 + $0x20] sm:$0xff] }
  0xcf   :  { %v3135_v57 = vmul.f32 %v3102_v49, %v3026_v63  ;;  %v295_v58 = vmul.f32 %v3102_v49, %v2880_v10  ;;  %v3152_v63 = vmul.f32 %v3102_v49, %v3040_v9  ;;  %v296_v61 = vmul.f32 %v3102_v49, %v2884_v12  ;;  %v658_v10 = vld [vmem:[%s3840_s2 + $0x10] sm:$0xff] }
  0xd0   :  { %2282 = vmatprep.mubr.msk.f32.mxu1 %vm87_vm0, %v3106_v50  ;;  %v297_v12 = vmul.f32 %v3102_v49, %v2888_v14  ;;  %v3176_v9 = vmul.f32 %v3102_v49, %v3054_v17  ;;  %v656_v14 = vld [vmem:[%s3840_s2] sm:$0xff]  ;;  %v3192_v17 = vmul.f32 %v3102_v49, %v3061_v21  ;;  %v3200_v0 = vmul.f32 %v3102_v49, %v3068_v25 }
  0xd1   :  { %2283 = vmatmul.mubr.msk.f32.vlgmr.msra.gmra.mxu1 %vm87_vm0, %v3110_v52  ;;  %2255 = vmatprep.mubr.msk.f32.mxu0 %vm87_vm0, %v295_v58  ;;  %v300_v1 = vmul.f32 %v3102_v49, %v2906_v5  ;;  %v301_v21 = vmul.f32 %v3102_v49, %v2912_v11  ;;  %v325_v5 = vmul.f32 %v3102_v49, %v3082_v34 }
  0xd2   :  { %2304 = vmatpush3.msra.mxu1 %v2873_v56  ;;  %2285 = vmatprep.mubr.msk.f32.mxu1 %vm87_vm0, %v3114_v53  ;;  %v3144_v56 = vmul.f32 %v3102_v49, %v3033_v2  ;;  %v3168_v2 = vmul.f32 %v3102_v49, %v3047_v13  ;;  %v298_v13 = vmul.f32 %v3102_v49, %v2892_v16 }
  0xd3   :  { %2305 = vmatprep.subr.mxu1 %v662_v55  ;;  %2256 = vmatmul.mubr.msk.f32.vlgmr.msra.gmra.mxu0 %vm87_vm0, %v296_v61  ;;  %v299_v16 = vmul.f32 %v3102_v49, %v2896_v18  ;;  %v324_v18 = vmul.f32 %v3102_v49, %v3075_v29  ;;  %v302_v11 = vmul.f32 %v3102_v49, %v2921_v15 }
  0xd4   :  { %2306 = vmatpush3.msra.mxu1 %v662_v55  ;;  %2258 = vmatprep.mubr.msk.f32.mxu0 %vm87_vm0, %v297_v12  ;;  %v303_v25 = vmul.f32 %v3102_v49, %v2928_v37  ;;  %v326_v29 = vmul.f32 %v3102_v49, %v3089_v38  ;;  %v304_v34 = vmul.f32 %v3102_v49, %v2935_v23 }
  0xd5   :  { %2286 = vmatmul.mubr.msk.f32.gmra.mxu1 %vm87_vm0, %v3125_v51  ;;  %2307 = vmatprep.subr.mxu1 %v661_v54  ;;  %v305_v15 = vmul.f32 %v3102_v49, %v2942_v27  ;;  %v306_v37 = vmul.f32 %v3102_v49, %v2949_v30  ;;  %v307_v38 = vmul.f32 %v3102_v49, %v2956_v33 }
  0xd6   :  { %2288 = vmatprep.mubr.msk.f32.mxu1 %vm87_vm0, %v3135_v57  ;;  %2308 = vmatpush3.msra.mxu1 %v661_v54  ;;  %v308_v23 = vmul.f32 %v3102_v49, %v2963_v36  ;;  %v309_v27 = vmul.f32 %v3102_v49, %v2970_v39  ;;  %v310_v30 = vmul.f32 %v3102_v49, %v2977_v42  ;;  %v1370_v39 = vld [vmem:[%s3841_s3] sm:$0xff]  ;;  %s2664_s3 = smov [#allocation8]  }
  0xd7   :  { %2309 = vmatprep.subr.mxu1 %v660_v60  ;;  %2259 = vmatmul.mubr.msk.f32.gmra.mxu0 %vm87_vm0, %v298_v13  ;;  %v311_v33 = vmul.f32 %v3102_v49, %v2984_v45  ;;  %v312_v36 = vmul.f32 %v3102_v49, %v2991_v48  ;;  %s1994_s20 = sshll.u32 %s2664_s3, 4  ;;  %s1995_s20 = int_to_ptr.vmem [resolvable:$true] %s1994_s20 }
  0xd8   :  { %2310 = vmatpush3.msra.mxu1 %v660_v60  ;;  %2261 = vmatprep.mubr.msk.f32.mxu0 %vm87_vm0, %v299_v16  ;;  %s2612_s21 = scalar_lea.vmem %s1995_s20, 256  ;;  %p2617_p11 = scmp.lt.s32.totalorder %s1995_s20, %s1995_s20 }
  0xd9   :  { %2289 = vmatmul.mubr.msk.f32.gmra.mxu1 %vm87_vm0, %v3144_v56  ;;  %2311 = vmatprep.subr.mxu1 %v659_v59  ;;  %p2613_p10 = scmp.ne.s32.totalorder %s1995_s20, %s2612_s21  ;;  %p2618_p12 = scmp.lt.s32.totalorder %s2612_s21, %s2612_s21 }
  0xda   :  { %2291 = vmatprep.mubr.msk.f32.mxu1 %vm87_vm0, %v3152_v63  ;;  %2312 = vmatpush3.msra.mxu1 %v659_v59 }
  0xdb   :  { %2313 = vmatprep.subr.mxu1 %v658_v10  ;;  %2262 = vmatmul.mubr.msk.f32.gmra.mxu0 %vm87_vm0, %v300_v1  ;;  %p2619_p13 = por %p2618_p12, %p2617_p11 }
  0xdc   :  { %2314 = vmatpush3.msra.mxu1 %v658_v10  ;;  %2264 = vmatprep.mubr.msk.f32.mxu0 %vm87_vm0, %v301_v21 }
  0xdd   :  { %2292 = vmatmul.mubr.msk.f32.gmra.mxu1 %vm87_vm0, %v3168_v2  ;;  %2315 = vmatprep.subr.mxu1 %v657_v62  ;;  %p2620_p0 = pnand %p2619_p13, %p2613_p10 }
  0xde   :  { %2294 = vmatprep.mubr.msk.f32.mxu1 %vm87_vm0, %v3176_v9  ;;  %2316 = vmatpush3.msra.mxu1 %v657_v62 }
  0xdf   :  { %2317 = vmatprep.subr.mxu1 %v656_v14  ;;  %2265 = vmatmul.mubr.msk.f32.gmra.mxu0 %vm87_vm0, %v302_v11 }
  0xe0   :  { %2318 = vmatpush3.msra.mxu1 %v656_v14  ;;  %2267 = vmatprep.mubr.msk.f32.mxu0 %vm87_vm0, %v303_v25 }
  0xe1   :  { %2295 = vmatmul.mubr.msk.f32.gmra.mxu1 %vm87_vm0, %v3192_v17  ;;  %2367 = vmatprep.subr.mxu0 %v1370_v39 }
  0xe2   :  { %2297 = vmatprep.mubr.msk.f32.mxu1 %vm87_vm0, %v3200_v0  ;;  %2368 = vmatpush3.msra.mxu0 %v1370_v39 }
  0xe3   :  { %2268 = vmatmul.mubr.msk.f32.gmra.mxu0 %vm87_vm0, %v304_v34 }
  0xe4   :  { %2270 = vmatprep.mubr.msk.f32.mxu0 %vm87_vm0, %v305_v15 }
  0xe5   :  { %2298 = vmatmul.mubr.msk.f32.gmra.mxu1 %vm87_vm0, %v324_v18 }
  0xe6   :  { %2300 = vmatprep.mubr.msk.f32.mxu1 %vm87_vm0, %v325_v5 }
  0xe7   :  { %2271 = vmatmul.mubr.msk.f32.gmra.mxu0 %vm87_vm0, %v306_v37 }
  0xe8   :  { %2273 = vmatprep.mubr.msk.f32.mxu0 %vm87_vm0, %v307_v38 }
  0xe9   :  { %2301 = vmatmul.mubr.msk.f32.gmra.mxu1 %vm87_vm0, %v326_v29 }
  0xea   :  { %2319 = vmatprep.mubr.msk.f32.mxu1 %vm87_vm0, %v295_v58 }
  0xeb   :  { %2274 = vmatmul.mubr.msk.f32.gmra.mxu0 %vm87_vm0, %v308_v23 }
  0xec   :  { %2276 = vmatprep.mubr.msk.f32.mxu0 %vm87_vm0, %v309_v27 }
  0xed   :  { %2320 = vmatmul.mubr.msk.f32.vlgmr.msra.gmra.mxu1 %vm87_vm0, %v296_v61 }
  0xee   :  { %2322 = vmatprep.mubr.msk.f32.mxu1 %vm87_vm0, %v297_v12 }
  0xef   :  { %2277 = vmatmul.mubr.msk.f32.gmra.mxu0 %vm87_vm0, %v310_v30 }
  0xf0   :  { %2279 = vmatprep.mubr.msk.f32.mxu0 %vm87_vm0, %v311_v33 }
  0xf1   :  { %2323 = vmatmul.mubr.msk.f32.gmra.mxu1 %vm87_vm0, %v298_v13 }
  0xf2   :  { %2325 = vmatprep.mubr.msk.f32.mxu1 %vm87_vm0, %v299_v16 }
  0xf3   :  { %2280 = vmatmul.mubr.msk.f32.gmra.mxu0 %vm87_vm0, %v312_v36 }
  0xf5   :  { %2326 = vmatmul.mubr.msk.f32.gmra.mxu1 %vm87_vm0, %v300_v1 }
  0xf6   :  { %2328 = vmatprep.mubr.msk.f32.mxu1 %vm87_vm0, %v301_v21 }
  0xf9   :  { %2329 = vmatmul.mubr.msk.f32.gmra.mxu1 %vm87_vm0, %v302_v11 }
  0xfa   :  { %2331 = vmatprep.mubr.msk.f32.mxu1 %vm87_vm0, %v303_v25 }
  0xfd   :  { %2332 = vmatmul.mubr.msk.f32.gmra.mxu1 %vm87_vm0, %v304_v34 }
  0xfe   :  { %2334 = vmatprep.mubr.msk.f32.mxu1 %vm87_vm0, %v305_v15 }
 0x101   :  { %2335 = vmatmul.mubr.msk.f32.gmra.mxu1 %vm87_vm0, %v306_v37 }
 0x102   :  { %2337 = vmatprep.mubr.msk.f32.mxu1 %vm87_vm0, %v307_v38 }
 0x105   :  { %2338 = vmatmul.mubr.msk.f32.gmra.mxu1 %vm87_vm0, %v308_v23 }
 0x106   :  { %2340 = vmatprep.mubr.msk.f32.mxu1 %vm87_vm0, %v309_v27 }
 0x109   :  { %2341 = vmatmul.mubr.msk.f32.gmra.mxu1 %vm87_vm0, %v310_v30 }
 0x10a   :  { %2343 = vmatprep.mubr.msk.f32.mxu1 %vm87_vm0, %v311_v33 }
 0x10d   :  { %2344 = vmatmul.mubr.msk.f32.gmra.mxu1 %vm87_vm0, %v312_v36 }
 0x10e   :  { %2346 = vmatprep.mubr.msk.f32.mxu1 %vm87_vm0, %v3106_v50 }
 0x111   :  { %2347 = vmatmul.mubr.msk.f32.gmra.mxu1 %vm87_vm0, %v3110_v52 }
 0x112   :  { %2349 = vmatprep.mubr.msk.f32.mxu1 %vm87_vm0, %v3114_v53 }
 0x115   :  { %2350 = vmatmul.mubr.msk.f32.gmra.mxu1 %vm87_vm0, %v3125_v51 }
 0x116   :  { %2352 = vmatprep.mubr.msk.f32.mxu1 %vm87_vm0, %v3135_v57 }
 0x119   :  { %2353 = vmatmul.mubr.msk.f32.gmra.mxu1 %vm87_vm0, %v3144_v56 }
 0x11a   :  { %2355 = vmatprep.mubr.msk.f32.mxu1 %vm87_vm0, %v3152_v63 }
 0x11d   :  { %2356 = vmatmul.mubr.msk.f32.gmra.mxu1 %vm87_vm0, %v3168_v2 }
 0x11e   :  { %2358 = vmatprep.mubr.msk.f32.mxu1 %vm87_vm0, %v3176_v9 }
 0x121   :  { %2359 = vmatmul.mubr.msk.f32.gmra.mxu1 %vm87_vm0, %v3192_v17 }
 0x122   :  { %2361 = vmatprep.mubr.msk.f32.mxu1 %vm87_vm0, %v3200_v0 }
 0x125   :  { %2362 = vmatmul.mubr.msk.f32.gmra.mxu1 %vm87_vm0, %v324_v18 }
 0x126   :  { %2364 = vmatprep.mubr.msk.f32.mxu1 %vm87_vm0, %v325_v5 }
 0x129   :  { %2365 = vmatmul.mubr.msk.f32.gmra.mxu1 %vm87_vm0, %v326_v29 }
 0x191   :  { %v3301_v42 = vpop.f32.mrf.mxu1 }
 0x192   :  { %3848 = vst [vmem:[#allocation14_spill] sm:$0xff] %v3301_v42 }
 0x193   :  { %v3303_v45 = vpop.f32.mrf.mxu1 }
 0x194   :  { %3849 = vst [vmem:[#allocation15_spill] sm:$0xff] %v3303_v45 }
 0x195   :  { %v3305_v48 = vpop.f32.mrf.mxu1 }
 0x196   :  { %3850 = vst [vmem:[#allocation16_spill] sm:$0xff] %v3305_v48 }
 0x197   :  { %v3307_v7 = vpop.f32.mrf.mxu1 }
 0x198   :  { %3851 = vst [vmem:[#allocation17_spill] sm:$0xff] %v3307_v7 }
 0x199   :  { %v3309_v43 = vpop.f32.mrf.mxu1 }
 0x19a   :  { %3852 = vst [vmem:[#allocation18_spill] sm:$0xff] %v3309_v43 }
 0x19b   :  { %v3311_v3 = vpop.f32.mrf.mxu1 }
 0x19c   :  { %3853 = vst [vmem:[#allocation19_spill] sm:$0xff] %v3311_v3 }
 0x19d   :  { %v3313_v20 = vpop.f32.mrf.mxu1 }
 0x19e   :  { %3854 = vst [vmem:[#allocation20_spill] sm:$0xff] %v3313_v20 }
 0x19f   :  { %v3315_v4 = vpop.f32.mrf.mxu1 }
 0x1a0   :  { %3855 = vst [vmem:[#allocation21_spill] sm:$0xff] %v3315_v4 }
 0x1a1   :  { %v3317_v6 = vpop.f32.mrf.mxu1 }
 0x1a2   :  { %3856 = vst [vmem:[#allocation22_spill] sm:$0xff] %v3317_v6 }
 0x1a3   :  { %v3319_v22 = vpop.f32.mrf.mxu1 }
 0x1a4   :  { %3857 = vst [vmem:[#allocation23_spill] sm:$0xff] %v3319_v22 }
 0x1a5   :  { %v3321_v47 = vpop.f32.mrf.mxu1 }
 0x1a6   :  { %3858 = vst [vmem:[#allocation24_spill] sm:$0xff] %v3321_v47 }
 0x1a7   :  { %v3323_v8 = vpop.f32.mrf.mxu1 }
 0x1a8   :  { %3859 = vst [vmem:[#allocation25_spill] sm:$0xff] %v3323_v8 }
 0x1a9   :  { %v3325_v24 = vpop.f32.mrf.mxu1 }
 0x1aa   :  { %3860 = vst [vmem:[#allocation26_spill] sm:$0xff] %v3325_v24 }
 0x1ab   :  { %v3327_v26 = vpop.f32.mrf.mxu1 }
 0x1ac   :  { %3861 = vst [vmem:[#allocation27_spill] sm:$0xff] %v3327_v26 }
 0x1ad   :  { %v2321_v28 = vpop.f32.mrf.mxu1 }
 0x1ae   :  { %v891_v32 = vsel %vm889_vm1, %v2321_v28, -inf }
 0x1af   :  { %v730_v31 = vpop.f32.mrf.mxu1 }
 0x1b0   :  { %v890_v19 = vsel %vm889_vm1, %v730_v31, -inf }
 0x1b1   :  { %v892_v35 = vmax.f32 %v890_v19, %v891_v32  ;;  %v2324_v40 = vpop.f32.mrf.mxu1 }
 0x1b2   :  { %v900_v46 = vsel %vm889_vm1, %v2324_v40, -inf }
 0x1b3   :  { %v893_v41 = vrot.slane %v892_v35, 4  ;;  %v740_v44 = vpop.f32.mrf.mxu1 }
 0x1b4   :  { %v899_v49 = vsel %vm889_vm1, %v740_v44, -inf }
 0x1b5   :  { %v894_v50 = vmax.f32 %v892_v35, %v893_v41  ;;  %v901_v52 = vmax.f32 %v899_v49, %v900_v46  ;;  %v3333_v53 = vpop.f32.mrf.mxu1 }
 0x1b6   :  { %v909_v57 = vsel %vm889_vm1, %v3333_v53, -inf }
 0x1b7   :  { %v895_v55 = vrot.slane %v894_v50, 2  ;;  %v902_v51 = vrot.slane %v901_v52, 4  ;;  %v750_v54 = vpop.f32.mrf.mxu1 }
 0x1b8   :  { %v908_v60 = vsel %vm889_vm1, %v750_v54, -inf }
 0x1b9   :  { %v896_v56 = vmax.f32 %v894_v50, %v895_v55  ;;  %v903_v58 = vmax.f32 %v901_v52, %v902_v51  ;;  %v910_v63 = vmax.f32 %v908_v60, %v909_v57  ;;  %v3338_v59 = vpop.f32.mrf.mxu1 }
 0x1ba   :  { %v918_v9 = vsel %vm889_vm1, %v3338_v59, -inf }
 0x1bb   :  { %v897_v61 = vrot.slane %v896_v56, 1  ;;  %v904_v10 = vrot.slane %v903_v58, 2  ;;  %v911_v2 = vrot.slane %v910_v63, 4  ;;  %v3340_v12 = vpop.f32.mrf.mxu1 }
 0x1bc   :  { %v917_v62 = vsel %vm889_vm1, %v3340_v12, -inf }
 0x1bd   :  { %v898_v13 = vmax.f32 %v896_v56, %v897_v61  ;;  %v905_v14 = vmax.f32 %v903_v58, %v904_v10  ;;  %v912_v17 = vmax.f32 %v910_v63, %v911_v2  ;;  %v919_v16 = vmax.f32 %v917_v62, %v918_v9  ;;  %v3346_v0 = vpop.f32.mrf.mxu1 }
 0x1be   :  { %v927_v29 = vsel %vm889_vm1, %v3346_v0, -inf }
 0x1bf   :  { %v1034_v1 = vsub.f32 %v730_v31, %v898_v13  ;;  %v1035_v21 = vsub.f32 %v2321_v28, %v898_v13  ;;  %v906_v18 = vrot.slane %v905_v14, 1  ;;  %v913_v5 = vrot.slane %v912_v17, 2  ;;  %v3348_v11 = vpop.f32.mrf.mxu1 }
 0x1c0   :  { %v920_v25 = vrot.slane %v919_v16, 4  ;;  %v926_v34 = vsel %vm889_vm1, %v3348_v11, -inf }
 0x1c1   :  { %v1066_v15 = vmul.f32 1.442695, %v1034_v1  ;;  %v1068_v37 = vmul.f32 1.442695, %v1035_v21  ;;  %v907_v38 = vmax.f32 %v905_v14, %v906_v18  ;;  %v914_v23 = vmax.f32 %v912_v17, %v913_v5  ;;  %v3354_v27 = vpop.f32.mrf.mxu1 }
 0x1c2   :  { %v921_v30 = vmax.f32 %v919_v16, %v920_v25  ;;  %v928_v33 = vmax.f32 %v926_v34, %v927_v29  ;;  %v936_v36 = vsel %vm889_vm1, %v3354_v27, -inf }
 0x1c3   :  { %2476 = vpow2.f32 %v1066_v15  ;;  %v1036_v39 = vsub.f32 %v740_v44, %v907_v38  ;;  %v1037_v28 = vsub.f32 %v2324_v40, %v907_v38  ;;  %v915_v31 = vrot.slane %v914_v23, 1  ;;  %v3358_v32 = vpop.f32.mrf.mxu1 }
 0x1c4   :  { %2478 = vpow2.f32 %v1068_v37  ;;  %v922_v19 = vrot.slane %v921_v30, 2  ;;  %v929_v35 = vrot.slane %v928_v33, 4  ;;  %v935_v41 = vsel %vm889_vm1, %v3358_v32, -inf }
 0x1c5   :  { %v1070_v46 = vmul.f32 1.442695, %v1036_v39  ;;  %v1072_v49 = vmul.f32 1.442695, %v1037_v28  ;;  %v916_v50 = vmax.f32 %v914_v23, %v915_v31  ;;  %v937_v52 = vmax.f32 %v935_v41, %v936_v36  ;;  %v3362_v55 = vpop.f32.mrf.mxu1 }
 0x1c6   :  { %v923_v51 = vmax.f32 %v921_v30, %v922_v19  ;;  %v930_v57 = vmax.f32 %v928_v33, %v929_v35  ;;  %v945_v40 = vsel %vm889_vm1, %v3362_v55, -inf }
 0x1c7   :  { %2480 = vpow2.f32 %v1070_v46  ;;  %v1038_v44 = vsub.f32 %v750_v54, %v916_v50  ;;  %v1039_v60 = vsub.f32 %v3333_v53, %v916_v50  ;;  %v938_v56 = vrot.slane %v937_v52, 4  ;;  %v3367_v58 = vpop.f32.mrf.mxu1 }
 0x1c8   :  { %2482 = vpow2.f32 %v1072_v49  ;;  %v924_v63 = vrot.slane %v923_v51, 1  ;;  %v931_v61 = vrot.slane %v930_v57, 2  ;;  %v944_v10 = vsel %vm889_vm1, %v3367_v58, -inf }
 0x1c9   :  { %v1074_v2 = vmul.f32 1.442695, %v1038_v44  ;;  %v1076_v9 = vmul.f32 1.442695, %v1039_v60  ;;  %v939_v62 = vmax.f32 %v937_v52, %v938_v56  ;;  %v946_v13 = vmax.f32 %v944_v10, %v945_v40  ;;  %v3371_v14 = vpop.f32.mrf.mxu1 }
 0x1ca   :  { %v925_v17 = vmax.f32 %v923_v51, %v924_v63  ;;  %v932_v16 = vmax.f32 %v930_v57, %v931_v61  ;;  %v954_v34 = vsel %vm889_vm1, %v3371_v14, -inf }
 0x1cb   :  { %2484 = vpow2.f32 %v1074_v2  ;;  %v940_v54 = vrot.slane %v939_v62, 2  ;;  %v947_v53 = vrot.slane %v946_v13, 4  ;;  %v3373_v1 = vpop.f32.mrf.mxu1 }
 0x1cc   :  { %2486 = vpow2.f32 %v1076_v9  ;;  %v1040_v21 = vsub.f32 %v3340_v12, %v925_v17  ;;  %v1041_v18 = vsub.f32 %v3338_v59, %v925_v17  ;;  %v933_v5 = vrot.slane %v932_v16, 1 }
 0x1cd   :  { %v941_v25 = vmax.f32 %v939_v62, %v940_v54  ;;  %v948_v29 = vmax.f32 %v946_v13, %v947_v53  ;;  %v953_v15 = vsel %vm889_vm1, %v3373_v1, -inf  ;;  %v3381_v37 = vpop.f32.mrf.mxu1 }
 0x1ce   :  { %v1078_v38 = vmul.f32 1.442695, %v1040_v21  ;;  %v1080_v23 = vmul.f32 1.442695, %v1041_v18  ;;  %v934_v30 = vmax.f32 %v932_v16, %v933_v5  ;;  %v955_v33 = vmax.f32 %v953_v15, %v954_v34 }
 0x1cf   :  { %v942_v36 = vrot.slane %v941_v25, 1  ;;  %v949_v39 = vrot.slane %v948_v29, 2  ;;  %v963_v59 = vsel %vm889_vm1, %v3381_v37, -inf  ;;  %v3385_v12 = vpop.f32.mrf.mxu1 }
 0x1d0   :  { %v3387_v28 = vpop.eup %2476  ;;  %2488 = vpow2.f32 %v1078_v38  ;;  %v1042_v31 = vsub.f32 %v3348_v11, %v934_v30  ;;  %v1043_v19 = vsub.f32 %v3346_v0, %v934_v30  ;;  %v956_v35 = vrot.slane %v955_v33, 4 }
 0x1d1   :  { %v3391_v41 = vpop.eup %2478  ;;  %v1130_v46 = vsel %vm889_vm1, %v3387_v28, 0.0  ;;  %2490 = vpow2.f32 %v1080_v23  ;;  %v943_v49 = vmax.f32 %v941_v25, %v942_v36  ;;  %v950_v50 = vmax.f32 %v948_v29, %v949_v39  ;;  %v3395_v52 = vpop.f32.mrf.mxu1 }
 0x1d2   :  { %v1131_v51 = vsel %vm889_vm1, %v3391_v41, 0.0  ;;  %v1082_v57 = vmul.f32 1.442695, %v1042_v31  ;;  %v1084_v40 = vmul.f32 1.442695, %v1043_v19  ;;  %v957_v44 = vmax.f32 %v955_v33, %v956_v35 }
 0x1d3   :  { %v3399_v11 = vadd.f32 %v1131_v51, %v1130_v46  ;;  %v1044_v0 = vsub.f32 %v3358_v32, %v943_v49  ;;  %v1045_v60 = vsub.f32 %v3354_v27, %v943_v49  ;;  %v951_v56 = vrot.slane %v950_v50, 1  ;;  %v3403_v63 = vpop.f32.mrf.mxu1 }
 0x1d4   :  { %v3405_v61 = vpop.eup %2480  ;;  %2492 = vpow2.f32 %v1082_v57  ;;  %v958_v10 = vrot.slane %v957_v44, 2  ;;  %v962_v2 = vsel %vm889_vm1, %v3385_v12, -inf  ;;  %v972_v9 = vsel %vm889_vm1, %v3395_v52, -inf }
 0x1d5   :  { %v3411_v62 = vpop.eup %2482  ;;  %v1139_v27 = vsel %vm889_vm1, %v3405_v61, 0.0  ;;  %2494 = vpow2.f32 %v1084_v40  ;;  %v1086_v32 = vmul.f32 1.442695, %v1044_v0  ;;  %v3416_v17 = vpop.f32.mrf.mxu1  ;;  %v1088_v54 = vmul.f32 1.442695, %v1045_v60 }
 0x1d6   :  { %v1140_v16 = vsel %vm889_vm1, %v3411_v62, 0.0  ;;  %v952_v53 = vmax.f32 %v950_v50, %v951_v56  ;;  %v959_v21 = vmax.f32 %v957_v44, %v958_v10  ;;  %v964_v5 = vmax.f32 %v962_v2, %v963_v59 }
 0x1d7   :  { %v3420_v18 = vadd.f32 %v1140_v16, %v1139_v27  ;;  %2496 = vpow2.f32 %v1086_v32  ;;  %v971_v25 = vsel %vm889_vm1, %v3403_v63, -inf  ;;  %v3424_v29 = vpop.f32.mrf.mxu1  ;;  %v981_v51 = vsel %vm889_vm1, %v3416_v17, -inf }
 0x1d8   :  { %v3426_v34 = vpop.eup %2484  ;;  %2498 = vpow2.f32 %v1088_v54  ;;  %v1046_v15 = vsub.f32 %v3367_v58, %v952_v53  ;;  %v1047_v38 = vsub.f32 %v3362_v55, %v952_v53  ;;  %v960_v23 = vrot.slane %v959_v21, 1 }
 0x1d9   :  { %v3430_v30 = vpop.eup %2486  ;;  %v1148_v36 = vsel %vm889_vm1, %v3426_v34, 0.0  ;;  %v965_v39 = vrot.slane %v964_v5, 4  ;;  %v973_v59 = vmax.f32 %v971_v25, %v972_v9  ;;  %v3435_v31 = vpop.f32.mrf.mxu1  ;;  %v980_v0 = vsel %vm889_vm1, %v3424_v29, -inf }
 0x1da   :  { %v1149_v19 = vsel %vm889_vm1, %v3430_v30, 0.0  ;;  %v1090_v35 = vmul.f32 1.442695, %v1046_v15  ;;  %v1092_v46 = vmul.f32 1.442695, %v1047_v38  ;;  %v961_v58 = vmax.f32 %v959_v21, %v960_v23 }
 0x1db   :  { %v3439_v49 = vadd.f32 %v1149_v19, %v1148_v36  ;;  %v966_v55 = vmax.f32 %v964_v5, %v965_v39  ;;  %v974_v50 = vrot.slane %v973_v59, 4  ;;  %v3443_v57 = vpop.f32.mrf.mxu1  ;;  %v990_v5 = vsel %vm889_vm1, %v3435_v31, -inf }
 0x1dc   :  { %2500 = vpow2.f32 %v1090_v35  ;;  %v1048_v40 = vsub.f32 %v3373_v1, %v961_v58  ;;  %v1049_v44 = vsub.f32 %v3371_v14, %v961_v58  ;;  %v982_v14 = vmax.f32 %v980_v0, %v981_v51 }
 0x1dd   :  { %v3449_v60 = vpop.eup %2488  ;;  %2502 = vpow2.f32 %v1092_v46  ;;  %v967_v10 = vrot.slane %v966_v55, 2  ;;  %v975_v2 = vmax.f32 %v973_v59, %v974_v50  ;;  %v3452_v9 = vpop.f32.mrf.mxu1  ;;  %v989_v23 = vsel %vm889_vm1, %v3443_v57, -inf }
 0x1de   :  { %v3454_v27 = vpop.eup %2490  ;;  %v1157_v32 = vsel %vm889_vm1, %v3449_v60, 0.0  ;;  %v1094_v1 = vmul.f32 1.442695, %v1048_v40  ;;  %v1096_v16 = vmul.f32 1.442695, %v1049_v44  ;;  %v983_v38 = vrot.slane %v982_v14, 4 }
 0x1df   :  { %v1158_v54 = vsel %vm889_vm1, %v3454_v27, 0.0  ;;  %v968_v53 = vmax.f32 %v966_v55, %v967_v10  ;;  %v976_v21 = vrot.slane %v975_v2, 2  ;;  %v3462_v25 = vpop.f32.mrf.mxu1  ;;  %v991_v19 = vmax.f32 %v989_v23, %v990_v5 }
 0x1e0   :  { %v3464_v15 = vadd.f32 %v1158_v54, %v1157_v32  ;;  %2504 = vpow2.f32 %v1094_v1  ;;  %v984_v50 = vmax.f32 %v982_v14, %v983_v38  ;;  %v999_v51 = vsel %vm889_vm1, %v3452_v9, -inf }
 0x1e1   :  { %v3468_v36 = vpop.eup %2492  ;;  %2506 = vpow2.f32 %v1096_v16  ;;  %v969_v39 = vrot.slane %v968_v53, 1  ;;  %v977_v59 = vmax.f32 %v975_v2, %v976_v21  ;;  %v3470_v35 = vpop.f32.mrf.mxu1  ;;  %v992_v10 = vrot.slane %v991_v19, 4 }
 0x1e2   :  { %v3472_v46 = vpop.eup %2494  ;;  %v1166_v55 = vsel %vm889_vm1, %v3468_v36, 0.0  ;;  %v985_v16 = vrot.slane %v984_v50, 2  ;;  %v998_v54 = vsel %vm889_vm1, %v3462_v25, -inf  ;;  %v1008_v14 = vsel %vm889_vm1, %v3470_v35, -inf }
 0x1e3   :  { %v1167_v40 = vsel %vm889_vm1, %v3472_v46, 0.0  ;;  %v970_v44 = vmax.f32 %v968_v53, %v969_v39  ;;  %v978_v0 = vrot.slane %v977_v59, 1  ;;  %v3481_v2 = vpop.f32.mrf.mxu1  ;;  %v993_v56 = vmax.f32 %v991_v19, %v992_v10 }
 0x1e4   :  { %v3483_v32 = vpop.eup %2496  ;;  %v3485_v1 = vadd.f32 %v1167_v40, %v1166_v55  ;;  %v986_v58 = vmax.f32 %v984_v50, %v985_v16  ;;  %v1007_v19 = vsel %vm889_vm1, %v3481_v2, -inf }
 0x1e5   :  { %v3491_v21 = vpop.eup %2498  ;;  %v1175_v53 = vsel %vm889_vm1, %v3483_v32, 0.0  ;;  %v1050_v5 = vsub.f32 %v3385_v12, %v970_v44  ;;  %v1051_v38 = vsub.f32 %v3381_v37, %v970_v44  ;;  %v979_v23 = vmax.f32 %v977_v59, %v978_v0  ;;  %v3497_v39 = vpop.f32.mrf.mxu1 }
 0x1e6   :  { %v1176_v40 = vsel %vm889_vm1, %v3491_v21, 0.0  ;;  %v987_v12 = vrot.slane %v986_v58, 1  ;;  %v994_v59 = vrot.slane %v993_v56, 2  ;;  %v1000_v44 = vmax.f32 %v998_v54, %v999_v51 }
 0x1e7   :  { %v3502_v33 = vadd.f32 %v1176_v40, %v1175_v53  ;;  %v1098_v13 = vmul.f32 1.442695, %v1050_v5  ;;  %v1100_v26 = vmul.f32 1.442695, %v1051_v38  ;;  %v1052_v24 = vsub.f32 %v3403_v63, %v979_v23  ;;  %v3505_v8 = vpop.f32.mrf.mxu1 }
 0x1e8   :  { %v1053_v37 = vsub.f32 %v3395_v52, %v979_v23  ;;  %v988_v52 = vmax.f32 %v986_v58, %v987_v12  ;;  %v995_v54 = vmax.f32 %v993_v56, %v994_v59  ;;  %v1001_v53 = vrot.slane %v1000_v44, 4 }
 0x1e9   :  { %v3508_v0 = vpop.eup %2500  ;;  %2508 = vpow2.f32 %v1098_v13  ;;  %v1102_v50 = vmul.f32 1.442695, %v1052_v24  ;;  %v3519_v5 = vpop.f32.mrf.mxu1  ;;  %v1009_v58 = vmax.f32 %v1007_v19, %v1008_v14  ;;  %v1016_v19 = vsel %vm889_vm1, %v3505_v8, -inf }
 0x1ea   :  { %v3513_v10 = vpop.eup %2502  ;;  %v1184_v63 = vsel %vm889_vm1, %v3508_v0, 0.0  ;;  %2510 = vpow2.f32 %v1100_v26  ;;  %v1104_v16 = vmul.f32 1.442695, %v1053_v37  ;;  %v1054_v13 = vsub.f32 %v3424_v29, %v988_v52 }
 0x1eb   :  { %v1185_v51 = vsel %vm889_vm1, %v3513_v10, 0.0  ;;  %2512 = vpow2.f32 %v1102_v50  ;;  %v1055_v38 = vsub.f32 %v3416_v17, %v988_v52  ;;  %v996_v26 = vrot.slane %v995_v54, 1 }
 0x1ec   :  { %v3521_v24 = vadd.f32 %v1185_v51, %v1184_v63  ;;  %2514 = vpow2.f32 %v1104_v16  ;;  %v1002_v40 = vmax.f32 %v1000_v44, %v1001_v53  ;;  %v1017_v37 = vsel %vm889_vm1, %v3497_v39, -inf  ;;  %v3536_v44 = vpop.f32.mrf.mxu1 }
 0x1ed   :  { %v3525_v23 = vpop.eup %2504  ;;  %v1106_v50 = vmul.f32 1.442695, %v1054_v13  ;;  %v1108_v63 = vmul.f32 1.442695, %v1055_v38  ;;  %v997_v29 = vmax.f32 %v995_v54, %v996_v26  ;;  %v1010_v52 = vrot.slane %v1009_v58, 4 }
 0x1ee   :  { %v3529_v12 = vpop.eup %2506  ;;  %v1193_v59 = vsel %vm889_vm1, %v3525_v23, 0.0  ;;  %v1003_v16 = vrot.slane %v1002_v40, 2  ;;  %v1026_v51 = vsel %vm889_vm1, %v3519_v5, -inf  ;;  %v1018_v56 = vmax.f32 %v1016_v19, %v1017_v37 }
 0x1ef   :  { %v1194_v17 = vsel %vm889_vm1, %v3529_v12, 0.0  ;;  %2516 = vpow2.f32 %v1106_v50  ;;  %v1056_v53 = vsub.f32 %v3443_v57, %v997_v29  ;;  %v1057_v13 = vsub.f32 %v3435_v31, %v997_v29 }
 0x1f0   :  { %v3538_v14 = vadd.f32 %v1194_v17, %v1193_v59  ;;  %2518 = vpow2.f32 %v1108_v63  ;;  %v1004_v38 = vmax.f32 %v1002_v40, %v1003_v16  ;;  %v1011_v26 = vmax.f32 %v1009_v58, %v1010_v52 }
 0x1f1   :  { %v1025_v59 = vsel %vm889_vm1, %v3536_v44, -inf  ;;  %v1110_v50 = vmul.f32 1.442695, %v1056_v53  ;;  %v1112_v17 = vmul.f32 1.442695, %v1057_v13  ;;  %v1019_v6 = vrot.slane %v1018_v56, 4 }
 0x1f2   :  { %v1005_v55 = vrot.slane %v1004_v38, 1  ;;  %v1027_v47 = vmax.f32 %v1025_v59, %v1026_v51  ;;  %v1012_v22 = vrot.slane %v1011_v26, 2  ;;  %v3862_v63 = vrot.slane %v3399_v11, 4 }
 0x1f3   :  { %v3863_v31 = vrot.slane %v3420_v18, 4  ;;  %2520 = vpow2.f32 %v1110_v50  ;;  %v3864_v29 = vrot.slane %v3439_v49, 4  ;;  %v1020_v51 = vmax.f32 %v1018_v56, %v1019_v6 }
 0x1f4   :  { %v1134_v57 = vadd.f32 %v3862_v63, %v3399_v11  ;;  %v1006_v58 = vmax.f32 %v1004_v38, %v1005_v55  ;;  %v1028_v37 = vrot.slane %v1027_v47, 4  ;;  %2522 = vpow2.f32 %v1112_v17 }
 0x1f5   :  { %v1143_v40 = vadd.f32 %v3863_v31, %v3420_v18  ;;  %v3558_v16 = vadd.f32 %v3864_v29, %v3439_v49  ;;  %v1013_v19 = vmax.f32 %v1011_v26, %v1012_v22  ;;  %v1021_v17 = vrot.slane %v1020_v51, 2 }
 0x1f6   :  { %v3560_v52 = vpop.eup %2508  ;;  %v1135_v53 = vrot.slane %v1134_v57, 2  ;;  %v1058_v18 = vsub.f32 %v3462_v25, %v1006_v58  ;;  %v1059_v55 = vsub.f32 %v3452_v9, %v1006_v58  ;;  %v1029_v38 = vmax.f32 %v1027_v47, %v1028_v37 }
 0x1f7   :  { %v3562_v13 = vpop.eup %2510  ;;  %v1202_v11 = vsel %vm889_vm1, %v3560_v52, 0.0  ;;  %v1014_v50 = vrot.slane %v1013_v19, 1  ;;  %v1022_v31 = vmax.f32 %v1020_v51, %v1021_v17  ;;  %v1144_v51 = vrot.slane %v1143_v40, 2 }
 0x1f8   :  { %v3568_v59 = vpop.eup %2512  ;;  %v1203_v49 = vsel %vm889_vm1, %v3562_v13, 0.0  ;;  %v1136_v22 = vadd.f32 %v1135_v53, %v1134_v57  ;;  %v1114_v63 = vmul.f32 1.442695, %v1058_v18  ;;  %v1116_v25 = vmul.f32 1.442695, %v1059_v55 }
 0x1f9   :  { %v3572_v6 = vpop.eup %2514  ;;  %v3574_v56 = vadd.f32 %v1203_v49, %v1202_v11  ;;  %v1211_v26 = vsel %vm889_vm1, %v3568_v59, 0.0  ;;  %v1015_v9 = vmax.f32 %v1013_v19, %v1014_v50  ;;  %v1030_v58 = vrot.slane %v1029_v38, 2 }
 0x1fa   :  { %v1212_v47 = vsel %vm889_vm1, %v3572_v6, 0.0  ;;  %2524 = vpow2.f32 %v1114_v63  ;;  %v1137_v57 = vrot.slane %v1136_v22, 1  ;;  %v1023_v49 = vrot.slane %v1022_v31, 1 }
 0x1fb   :  { %v1205_v37 = vrot.slane %v3574_v56, 4  ;;  %v3581_v29 = vadd.f32 %v1212_v47, %v1211_v26  ;;  %2526 = vpow2.f32 %v1116_v25  ;;  %v1060_v53 = vsub.f32 %v3481_v2, %v1015_v9 }
 0x1fc   :  { %v1061_v11 = vsub.f32 %v3470_v35, %v1015_v9  ;;  %v3585_v18 = vpop.eup %2516  ;;  %v1031_v54 = vmax.f32 %v1029_v38, %v1030_v58  ;;  %v3588_v19 = vadd.f32 %v1137_v57, %v1136_v22  ;;  %v1024_v25 = vmax.f32 %v1022_v31, %v1023_v49 }
 0x1fd   :  { %v3590_v50 = vpop.eup %2518  ;;  %v1220_v17 = vsel %vm889_vm1, %v3585_v18, 0.0  ;;  %v1118_v26 = vmul.f32 1.442695, %v1060_v53  ;;  %v1145_v47 = vadd.f32 %v1144_v51, %v1143_v40  ;;  %v1153_v53 = vrot.slane %v3558_v16, 2 }
 0x1fe   :  { %v1120_v63 = vmul.f32 1.442695, %v1061_v11  ;;  %v1221_v35 = vsel %vm889_vm1, %v3590_v50, 0.0  ;;  %v1032_v2 = vrot.slane %v1031_v54, 1  ;;  %2528 = vrcp.f32 %v3588_v19 }
 0x1ff   :  { %v3597_v9 = vadd.f32 %v1221_v35, %v1220_v17  ;;  %2530 = vpow2.f32 %v1118_v26  ;;  %v1062_v38 = vsub.f32 %v3505_v8, %v1024_v25  ;;  %v1063_v22 = vsub.f32 %v3497_v39, %v1024_v25 }
 0x200   :  { %2532 = vpow2.f32 %v1120_v63  ;;  %v1033_v58 = vmax.f32 %v1031_v54, %v1032_v2  ;;  %v1146_v57 = vrot.slane %v1145_v47, 1  ;;  %v3602_v31 = vpop.eup %2520  ;;  %v3865_v40 = vrot.slane %v3464_v15, 4 }
 0x201   :  { %v1122_v49 = vmul.f32 1.442695, %v1062_v38  ;;  %v1124_v55 = vmul.f32 1.442695, %v1063_v22  ;;  %v3608_v17 = vpop.eup %2522  ;;  %v1229_v8 = vsel %vm889_vm1, %v3602_v31, 0.0  ;;  %v1154_v25 = vadd.f32 %v1153_v53, %v3558_v16 }
 0x202   :  { %v1161_v51 = vadd.f32 %v3865_v40, %v3464_v15  ;;  %v1064_v39 = vsub.f32 %v3536_v44, %v1033_v58  ;;  %v1065_v54 = vsub.f32 %v3519_v5, %v1033_v58  ;;  %v3614_v26 = vadd.f32 %v1146_v57, %v1145_v47 }
 0x203   :  { %v1230_v63 = vsel %vm889_vm1, %v3608_v17, 0.0  ;;  %2534 = vpow2.f32 %v1122_v49  ;;  %v1155_v22 = vrot.slane %v1154_v25, 1  ;;  %v3866_v5 = vrot.slane %v3485_v1, 4 }
 0x204   :  { %v1162_v35 = vrot.slane %v1161_v51, 2  ;;  %v3619_v2 = vadd.f32 %v1230_v63, %v1229_v8  ;;  %2536 = vpow2.f32 %v1124_v55  ;;  %v1126_v15 = vmul.f32 1.442695, %v1064_v39 }
 0x205   :  { %v1128_v38 = vmul.f32 1.442695, %v1065_v54  ;;  %2538 = vrcp.f32 %v3614_v26  ;;  %v1170_v47 = vadd.f32 %v3866_v5, %v3485_v1  ;;  %v3867_v16 = vrot.slane %v3502_v33, 4 }
 0x206   :  { %v1163_v44 = vadd.f32 %v1162_v35, %v1161_v51  ;;  %2540 = vpow2.f32 %v1126_v15  ;;  %v3868_v55 = vrot.slane %v3521_v24, 4  ;;  %v3634_v40 = vadd.f32 %v1155_v22, %v1154_v25 }
 0x207   :  { %v1179_v57 = vadd.f32 %v3867_v16, %v3502_v33  ;;  %v3632_v49 = vpop.eup %2524  ;;  %2542 = vpow2.f32 %v1128_v38  ;;  %v1171_v8 = vrot.slane %v1170_v47, 2  ;;  %v3869_v33 = vrot.slane %v3538_v14, 4 }
 0x208   :  { %v1188_v53 = vadd.f32 %v3868_v55, %v3521_v24  ;;  %v1164_v51 = vrot.slane %v1163_v44, 1  ;;  %v3636_v39 = vpop.eup %2526  ;;  %v1238_v1 = vsel %vm889_vm1, %v3632_v49, 0.0  ;;  %2544 = vrcp.f32 %v3634_v40 }
 0x209   :  { %v1180_v54 = vrot.slane %v1179_v57, 2  ;;  %v1197_v35 = vadd.f32 %v3869_v33, %v3538_v14  ;;  %v1239_v24 = vsel %vm889_vm1, %v3636_v39, 0.0  ;;  %v1172_v15 = vadd.f32 %v1171_v8, %v1170_v47 }
 0x20a   :  { %v1189_v63 = vrot.slane %v1188_v53, 2  ;;  %v3646_v25 = vadd.f32 %v1164_v51, %v1163_v44  ;;  %v3648_v38 = vadd.f32 %v1239_v24, %v1238_v1  ;;  %v1206_v14 = vadd.f32 %v1205_v37, %v3574_v56 }
 0x20b   :  { %v1181_v22 = vadd.f32 %v1180_v54, %v1179_v57  ;;  %v1198_v16 = vrot.slane %v1197_v35, 2  ;;  %v2529_v55 = vpop.eup %2528  ;;  %v1173_v58 = vrot.slane %v1172_v15, 1  ;;  %v3870_v33 = vrot.slane %v3581_v29, 4 }
 0x20c   :  { %v1190_v5 = vadd.f32 %v1189_v63, %v1188_v53  ;;  %2546 = vrcp.f32 %v3646_v25  ;;  %v3657_v44 = vpop.eup %2530  ;;  %v1241_v47 = vrot.slane %v3648_v38, 4  ;;  %v1290_v57 = vmul.f32 %v2529_v55, %v3588_v19 }
 0x20d   :  { %v1215_v11 = vadd.f32 %v3870_v33, %v3581_v29  ;;  %v1182_v53 = vrot.slane %v1181_v22, 1  ;;  %v3661_v8 = vpop.eup %2532  ;;  %v1247_v1 = vsel %vm889_vm1, %v3657_v44, 0.0  ;;  %v3665_v54 = vadd.f32 %v1173_v58, %v1172_v15 }
 0x20e   :  { %v1191_v51 = vrot.slane %v1190_v5, 1  ;;  %v1199_v56 = vadd.f32 %v1198_v16, %v1197_v35  ;;  %v1207_v37 = vrot.slane %v1206_v14, 2  ;;  %v1248_v29 = vsel %vm889_vm1, %v3661_v8, 0.0 }
 0x20f   :  { %v1306_v63 = vsub.f32 2.0, %v1290_v57  ;;  %v3669_v24 = vadd.f32 %v1182_v53, %v1181_v22  ;;  %v1249_v19 = vadd.f32 %v1248_v29, %v1247_v1  ;;  %2548 = vrcp.f32 %v3665_v54 }
 0x210   :  { %v3671_v33 = vadd.f32 %v1191_v51, %v1190_v5  ;;  %v1200_v4 = vrot.slane %v1199_v56, 1  ;;  %v1208_v20 = vadd.f32 %v1207_v37, %v1206_v14  ;;  %v3674_v3 = vpop.eup %2534  ;;  %v1216_v58 = vrot.slane %v1215_v11, 2 }
 0x211   :  { %v1322_v43 = vmul.f32 %v2529_v55, %v1306_v63  ;;  %2550 = vrcp.f32 %v3669_v24  ;;  %v3871_v35 = vrot.slane %v3597_v9, 4  ;;  %v3680_v16 = vpop.eup %2536  ;;  %v1250_v22 = vrot.slane %v1249_v19, 4 }
 0x212   :  { %v1256_v5 = vsel %vm889_vm1, %v3674_v3, 0.0  ;;  %2552 = vrcp.f32 %v3671_v33  ;;  %v3685_v57 = vadd.f32 %v1200_v4, %v1199_v56  ;;  %v2539_v14 = vpop.eup %2538  ;;  %v1257_v55 = vsel %vm889_vm1, %v3680_v16, 0.0 }
 0x213   :  { %v1224_v15 = vadd.f32 %v3871_v35, %v3597_v9  ;;  %v1338_v53 = vmul.f32 %v3387_v28, %v1322_v43  ;;  %v1339_v51 = vmul.f32 %v3391_v41, %v1322_v43  ;;  %v1209_v1 = vrot.slane %v1208_v20, 1  ;;  %v3691_v9 = vpop.eup %2540 }
 0x214   :  { %3872 = vst [vmem:[#allocation28_spill] sm:$0xff] %v3691_v9  ;;  %v1258_v37 = vadd.f32 %v1257_v55, %v1256_v5  ;;  %v1291_v29 = vmul.f32 %v2539_v14, %v3614_v26  ;;  %2554 = vrcp.f32 %v3685_v57  ;;  %v1217_v63 = vadd.f32 %v1216_v58, %v1215_v11  ;;  %v3695_v35 = vpop.eup %2542 }
 0x215   :  { %3873 = vst [vmem:[#allocation29_spill] sm:$0xff] %v3695_v35  ;;  %v1265_v4 = vsel %vm889_vm1, %v3691_v9, 0.0  ;;  %2369 = vmatprep.mubr.msk.f32.mxu0 %vm889_vm1, %v1338_v53  ;;  %v3700_v56 = vadd.f32 %v1209_v1, %v1208_v20  ;;  %v1225_v28 = vrot.slane %v1224_v15, 2  ;;  %v3874_v43 = vrot.slane %v3619_v2, 4  ;;  %v2545_v55 = vpop.eup %2544 }
 0x216   :  { %v1259_v5 = vrot.slane %v1258_v37, 4  ;;  %v1266_v26 = vsel %vm889_vm1, %v3695_v35, 0.0  ;;  %2370 = vmatmul.mubr.msk.f32.vlgmr.msra.gmra.mxu0 %vm889_vm1, %v1339_v51  ;;  %v1307_v11 = vsub.f32 2.0, %v1291_v29  ;;  %v1218_v58 = vrot.slane %v1217_v63, 1 }
 0x217   :  { %v1233_v41 = vadd.f32 %v3874_v43, %v3619_v2  ;;  %v1267_v48 = vadd.f32 %v1266_v26, %v1265_v4  ;;  %2556 = vrcp.f32 %v3700_v56  ;;  %v1226_v53 = vadd.f32 %v1225_v28, %v1224_v15 }
 0x218   :  { %v1323_v1 = vmul.f32 %v2539_v14, %v1307_v11  ;;  %v1292_v7 = vmul.f32 %v2545_v55, %v3634_v40  ;;  %v3710_v42 = vadd.f32 %v1218_v58, %v1217_v63  ;;  %v1242_v2 = vadd.f32 %v1241_v47, %v3648_v38 }
 0x219   :  { %v1234_v20 = vrot.slane %v1233_v41, 2  ;;  %v2547_v43 = vpop.eup %2546  ;;  %v1268_v45 = vrot.slane %v1267_v48, 4  ;;  %v1227_v35 = vrot.slane %v1226_v53, 1  ;;  %v1251_v51 = vadd.f32 %v1250_v22, %v1249_v19 }
 0x21a   :  { %v1340_v29 = vmul.f32 %v3405_v61, %v1323_v1  ;;  %v1341_v4 = vmul.f32 %v3411_v62, %v1323_v1  ;;  %v1308_v26 = vsub.f32 2.0, %v1292_v7  ;;  %v1293_v15 = vmul.f32 %v2547_v43, %v3646_v25 }
 0x21b   :  { %v1235_v9 = vadd.f32 %v1234_v20, %v1233_v41  ;;  %2558 = vrcp.f32 %v3710_v42  ;;  %v3717_v14 = vadd.f32 %v1227_v35, %v1226_v53  ;;  %v1243_v63 = vrot.slane %v1242_v2, 2 }
 0x21c   :  { %2372 = vmatprep.mubr.msk.f32.mxu0 %vm889_vm1, %v1340_v29  ;;  %v1324_v38 = vmul.f32 %v2545_v55, %v1308_v26  ;;  %v1309_v47 = vsub.f32 2.0, %v1293_v15  ;;  %v1252_v28 = vrot.slane %v1251_v51, 2  ;;  %v2549_v41 = vpop.eup %2548  ;;  %v1260_v62 = vadd.f32 %v1259_v5, %v1258_v37 }
 0x21d   :  { %v1236_v40 = vrot.slane %v1235_v9, 1  ;;  %2373 = vmatmul.mubr.msk.f32.gmra.mxu0 %vm889_vm1, %v1341_v4  ;;  %2560 = vrcp.f32 %v3717_v14  ;;  %v1244_v7 = vadd.f32 %v1243_v63, %v1242_v2  ;;  %v1294_v11 = vmul.f32 %v2549_v41, %v3665_v54 }
 0x21e   :  { %v2551_v25 = vpop.eup %2550  ;;  %v1342_v19 = vmul.f32 %v3426_v34, %v1324_v38  ;;  %v1343_v22 = vmul.f32 %v3430_v30, %v1324_v38  ;;  %v1325_v35 = vmul.f32 %v2547_v43, %v1309_v47  ;;  %v1253_v20 = vadd.f32 %v1252_v28, %v1251_v51 }
 0x21f   :  { %v3722_v61 = vadd.f32 %v1236_v40, %v1235_v9  ;;  %v2553_v58 = vpop.eup %2552  ;;  %v1295_v55 = vmul.f32 %v2551_v25, %v3669_v24  ;;  %v1245_v53 = vrot.slane %v1244_v7, 1  ;;  %v1269_v1 = vadd.f32 %v1268_v45, %v1267_v48 }
 0x220   :  { %2375 = vmatprep.mubr.msk.f32.mxu0 %vm889_vm1, %v1342_v19  ;;  %v1344_v9 = vmul.f32 %v3449_v60, %v1325_v35  ;;  %v1310_v2 = vsub.f32 2.0, %v1294_v11  ;;  %v1296_v37 = vmul.f32 %v2553_v58, %v3671_v33  ;;  %v1345_v30 = vmul.f32 %v3454_v27, %v1325_v35 }
 0x221   :  { %2562 = vrcp.f32 %v3722_v61  ;;  %v2555_v34 = vpop.eup %2554  ;;  %2376 = vmatmul.mubr.msk.f32.gmra.mxu0 %vm889_vm1, %v1343_v22  ;;  %v1311_v54 = vsub.f32 2.0, %v1295_v55  ;;  %v1254_v5 = vrot.slane %v1253_v20, 1  ;;  %v1261_v24 = vrot.slane %v1260_v62, 2 }
 0x222   :  { %2378 = vmatprep.mubr.msk.f32.mxu0 %vm889_vm1, %v1344_v9  ;;  %v1326_v45 = vmul.f32 %v2549_v41, %v1310_v2  ;;  %v1312_v48 = vsub.f32 2.0, %v1296_v37  ;;  %v1297_v43 = vmul.f32 %v2555_v34, %v3685_v57  ;;  %v1246_v60 = vadd.f32 %v1245_v53, %v1244_v7 }
 0x223   :  { %v1327_v51 = vmul.f32 %v2551_v25, %v1311_v54  ;;  %v1262_v29 = vadd.f32 %v1261_v24, %v1260_v62  ;;  %v1270_v33 = vrot.slane %v1269_v1, 2  ;;  %v1255_v63 = vadd.f32 %v1254_v5, %v1253_v20 }
 0x224   :  { %v2557_v4 = vpop.eup %2556  ;;  %v1346_v26 = vmul.f32 %v3468_v36, %v1326_v45  ;;  %v1347_v27 = vmul.f32 %v3472_v46, %v1326_v45  ;;  %v1313_v15 = vsub.f32 2.0, %v1297_v43  ;;  %v1328_v57 = vmul.f32 %v2553_v58, %v1312_v48 }
 0x225   :  { %2379 = vmatmul.mubr.msk.f32.gmra.mxu0 %vm889_vm1, %v1345_v30  ;;  %v1298_v40 = vmul.f32 %v2557_v4, %v3700_v56  ;;  %v1348_v38 = vmul.f32 %v3483_v32, %v1327_v51  ;;  %2564 = vrcp.f32 %v1246_v60  ;;  %v1263_v47 = vrot.slane %v1262_v29, 1 }
 0x226   :  { %2381 = vmatprep.mubr.msk.f32.mxu0 %vm889_vm1, %v1346_v26  ;;  %v1271_v28 = vadd.f32 %v1270_v33, %v1269_v1  ;;  %v1349_v36 = vmul.f32 %v3491_v21, %v1327_v51  ;;  %v1329_v7 = vmul.f32 %v2555_v34, %v1313_v15  ;;  %2566 = vrcp.f32 %v1255_v63 }
 0x227   :  { %v1314_v62 = vsub.f32 2.0, %v1298_v40  ;;  %v1350_v56 = vmul.f32 %v3508_v0, %v1328_v57  ;;  %v1264_v32 = vadd.f32 %v1263_v47, %v1262_v29  ;;  %v1351_v35 = vmul.f32 %v3513_v10, %v1328_v57  ;;  %v1847_v57 = vld [vmem:[#allocation5 + $0x58] sm:$0xff]  ;;  %v1846_v47 = vld [vmem:[#allocation5 + $0x50] sm:$0xff] }
 0x228   :  { %v2559_v41 = vpop.eup %2558  ;;  %v1272_v19 = vrot.slane %v1271_v28, 1  ;;  %v1352_v11 = vmul.f32 %v3525_v23, %v1329_v7 }
 0x229   :  { %2382 = vmatmul.mubr.msk.f32.gmra.mxu0 %vm889_vm1, %v1347_v27  ;;  %v1299_v25 = vmul.f32 %v2559_v41, %v3710_v42  ;;  %v1330_v21 = vmul.f32 %v2557_v4, %v1314_v62  ;;  %2568 = vrcp.f32 %v1264_v32  ;;  %v1353_v42 = vmul.f32 %v3529_v12, %v1329_v7  ;;  %v1844_v7 = vld [vmem:[#allocation5 + $0x40] sm:$0xff] }
 0x22a   :  { %v2561_v46 = vpop.eup %2560  ;;  %2384 = vmatprep.mubr.msk.f32.mxu0 %vm889_vm1, %v1348_v38  ;;  %v1273_v53 = vadd.f32 %v1272_v19, %v1271_v28  ;;  %v1849_v38 = vld [vmem:[#allocation5 + $0x68] sm:$0xff]  ;;  %v2257_v28 = vpop.f32.mrf.mxu0  ;;  %v1840_v19 = vld [vmem:[#allocation5 + $0x20] sm:$0xff] }
 0x22b   :  { %v1315_v58 = vsub.f32 2.0, %v1299_v25  ;;  %v1300_v55 = vmul.f32 %v2561_v46, %v3717_v14  ;;  %v1354_v0 = vmul.f32 %v3560_v52, %v1330_v21  ;;  %v1355_v14 = vmul.f32 %v3562_v13, %v1330_v21 }
 0x22c   :  { %2570 = vrcp.f32 %v1273_v53 }
 0x22d   :  { %2385 = vmatmul.mubr.msk.f32.gmra.mxu0 %vm889_vm1, %v1349_v36  ;;  %v1331_v20 = vmul.f32 %v2559_v41, %v1315_v58  ;;  %v1316_v10 = vsub.f32 2.0, %v1300_v55  ;;  %v1845_v41 = vld [vmem:[#allocation5 + $0x48] sm:$0xff]  ;;  %v497_v36 = vpop.f32.mrf.mxu0  ;;  %v1836_v55 = vld [vmem:[#allocation5] sm:$0xff] }
 0x22e   :  { %v2563_v22 = vpop.eup %2562  ;;  %2387 = vmatprep.mubr.msk.f32.mxu0 %vm889_vm1, %v1350_v56  ;;  %v1842_v56 = vld [vmem:[#allocation5 + $0x30] sm:$0xff]  ;;  %v1837_v58 = vld [vmem:[#allocation5 + $0x8] sm:$0xff] }
 0x22f   :  { %v1301_v23 = vmul.f32 %v2563_v22, %v3722_v61  ;;  %v1356_v2 = vmul.f32 %v3568_v59, %v1331_v20  ;;  %v1332_v12 = vmul.f32 %v2561_v46, %v1316_v10  ;;  %v1357_v34 = vmul.f32 %v3572_v6, %v1331_v20  ;;  %v2260_v62 = vpop.f32.mrf.mxu0  ;;  %v1843_v46 = vld [vmem:[#allocation5 + $0x38] sm:$0xff] }
 0x231   :  { %2388 = vmatmul.mubr.msk.f32.gmra.mxu0 %vm889_vm1, %v1351_v35  ;;  %v1317_v37 = vsub.f32 2.0, %v1301_v23  ;;  %v1358_v61 = vmul.f32 %v3585_v18, %v1332_v12  ;;  %v1359_v24 = vmul.f32 %v3590_v50, %v1332_v12  ;;  %v507_v25 = vpop.f32.mrf.mxu0  ;;  %v1839_v35 = vld [vmem:[#allocation5 + $0x18] sm:$0xff] }
 0x232   :  { %2390 = vmatprep.mubr.msk.f32.mxu0 %vm889_vm1, %v1352_v11  ;;  %v2565_v1 = vpop.eup %2564  ;;  %v1838_v11 = vld [vmem:[#allocation5 + $0x10] sm:$0xff] }
 0x233   :  { %v2567_v9 = vpop.eup %2566  ;;  %v1302_v52 = vmul.f32 %v2565_v1, %v1246_v60  ;;  %v1333_v30 = vmul.f32 %v2563_v22, %v1317_v37  ;;  %v2263_v22 = vpop.f32.mrf.mxu0 }
 0x234   :  { %v1303_v5 = vmul.f32 %v2567_v9, %v1255_v63 }
 0x235   :  { %2391 = vmatmul.mubr.msk.f32.gmra.mxu0 %vm889_vm1, %v1353_v42  ;;  %v1318_v54 = vsub.f32 2.0, %v1302_v52  ;;  %v1360_v59 = vmul.f32 %v3602_v31, %v1333_v30  ;;  %v1361_v18 = vmul.f32 %v3608_v17, %v1333_v30  ;;  %v517_v21 = vpop.f32.mrf.mxu0 }
 0x236   :  { %2393 = vmatprep.mubr.msk.f32.mxu0 %vm889_vm1, %v1354_v0  ;;  %v2569_v13 = vpop.eup %2568  ;;  %v1319_v48 = vsub.f32 2.0, %v1303_v5 }
 0x237   :  { %v1334_v45 = vmul.f32 %v2565_v1, %v1318_v54  ;;  %v1304_v43 = vmul.f32 %v2569_v13, %v1264_v32  ;;  %v1841_v32 = vld [vmem:[#allocation5 + $0x28] sm:$0xff] }
 0x238   :  { %v1335_v51 = vmul.f32 %v2567_v9, %v1319_v48 }
 0x239   :  { %2394 = vmatmul.mubr.msk.f32.gmra.mxu0 %vm889_vm1, %v1355_v14  ;;  %v2571_v6 = vpop.eup %2570  ;;  %v1362_v60 = vmul.f32 %v3632_v49, %v1334_v45  ;;  %v1320_v29 = vsub.f32 2.0, %v1304_v43  ;;  %v1363_v50 = vmul.f32 %v3636_v39, %v1334_v45  ;;  %v3875_v39 = vld [vmem:[#allocation28_spill] sm:$0xff] }
 0x23a   :  { %2396 = vmatprep.mubr.msk.f32.mxu0 %vm889_vm1, %v1356_v2  ;;  %v1305_v33 = vmul.f32 %v2571_v6, %v1273_v53  ;;  %v1364_v31 = vmul.f32 %v3657_v44, %v1335_v51  ;;  %v1365_v17 = vmul.f32 %v3661_v8, %v1335_v51  ;;  %v3876_v44 = vld [vmem:[#allocation29_spill] sm:$0xff]  ;;  %v2266_v53 = vpop.f32.mrf.mxu0 }
 0x23b   :  { %v1336_v4 = vmul.f32 %v2569_v13, %v1320_v29  ;;  %v1851_v8 = vld [vmem:[#allocation5 + $0x78] sm:$0xff] }
 0x23c   :  { %v1321_v26 = vsub.f32 2.0, %v1305_v33  ;;  %2417 = vmatprep.subr.mxu1 %v1851_v8  ;;  %v527_v42 = vpop.f32.mrf.mxu0 }
 0x23d   :  { %2397 = vmatmul.mubr.msk.f32.gmra.mxu0 %vm889_vm1, %v1357_v34  ;;  %v1366_v49 = vmul.f32 %v3674_v3, %v1336_v4  ;;  %v1367_v15 = vmul.f32 %v3680_v16, %v1336_v4  ;;  %2418 = vmatpush3.msra.mxu1 %v1851_v8  ;;  %v1850_v3 = vld [vmem:[#allocation5 + $0x70] sm:$0xff]  ;;  %v1848_v16 = vld [vmem:[#allocation5 + $0x60] sm:$0xff] }
 0x23e   :  { %2399 = vmatprep.mubr.msk.f32.mxu0 %vm889_vm1, %v1358_v61  ;;  %v1337_v27 = vmul.f32 %v2571_v6, %v1321_v26  ;;  %2419 = vmatprep.subr.mxu1 %v1850_v3  ;;  %v2269_v0 = vpop.f32.mrf.mxu0 }
 0x23f   :  { %2420 = vmatpush3.msra.mxu1 %v1850_v3 }
 0x240   :  { %v1368_v40 = vmul.f32 %v3875_v39, %v1337_v27  ;;  %v1369_v63 = vmul.f32 %v3876_v44, %v1337_v27  ;;  %2421 = vmatprep.subr.mxu1 %v1849_v38  ;;  %v537_v20 = vpop.f32.mrf.mxu0 }
 0x241   :  { %2400 = vmatmul.mubr.msk.f32.gmra.mxu0 %vm889_vm1, %v1359_v24  ;;  %2422 = vmatpush3.msra.mxu1 %v1849_v38 }
 0x242   :  { %2402 = vmatprep.mubr.msk.f32.mxu0 %vm889_vm1, %v1360_v59  ;;  %2423 = vmatprep.subr.mxu1 %v1848_v16  ;;  %v2272_v10 = vpop.f32.mrf.mxu0 }
 0x243   :  { %2424 = vmatpush3.msra.mxu1 %v1848_v16 }
 0x244   :  { %2425 = vmatprep.subr.mxu1 %v1847_v57  ;;  %v547_v23 = vpop.f32.mrf.mxu0 }
 0x245   :  { %2403 = vmatmul.mubr.msk.f32.gmra.mxu0 %vm889_vm1, %v1361_v18  ;;  %2426 = vmatpush3.msra.mxu1 %v1847_v57 }
 0x246   :  { %2405 = vmatprep.mubr.msk.f32.mxu0 %vm889_vm1, %v1362_v60  ;;  %2427 = vmatprep.subr.mxu1 %v1846_v47  ;;  %v2275_v1 = vpop.f32.mrf.mxu0 }
 0x247   :  { %2428 = vmatpush3.msra.mxu1 %v1846_v47 }
 0x248   :  { %2429 = vmatprep.subr.mxu1 %v1845_v41  ;;  %v557_v14 = vpop.f32.mrf.mxu0 }
 0x249   :  { %2406 = vmatmul.mubr.msk.f32.gmra.mxu0 %vm889_vm1, %v1363_v50  ;;  %2430 = vmatpush3.msra.mxu1 %v1845_v41 }
 0x24a   :  { %2408 = vmatprep.mubr.msk.f32.mxu0 %vm889_vm1, %v1364_v31  ;;  %2431 = vmatprep.subr.mxu1 %v1844_v7  ;;  %v2278_v9 = vpop.f32.mrf.mxu0 }
 0x24b   :  { %2432 = vmatpush3.msra.mxu1 %v1844_v7 }
 0x24c   :  { %2433 = vmatprep.subr.mxu1 %v1843_v46  ;;  %v567_v2 = vpop.f32.mrf.mxu0 }
 0x24d   :  { %2409 = vmatmul.mubr.msk.f32.gmra.mxu0 %vm889_vm1, %v1365_v17  ;;  %2434 = vmatpush3.msra.mxu1 %v1843_v46 }
 0x24e   :  { %2411 = vmatprep.mubr.msk.f32.mxu0 %vm889_vm1, %v1366_v49  ;;  %2435 = vmatprep.subr.mxu1 %v1842_v56  ;;  %v3789_v12 = vpop.f32.mrf.mxu0 }
 0x24f   :  { %2436 = vmatpush3.msra.mxu1 %v1842_v56 }
 0x250   :  { %2437 = vmatprep.subr.mxu1 %v1841_v32  ;;  %v3791_v37 = vpop.f32.mrf.mxu0 }
 0x251   :  { %2412 = vmatmul.mubr.msk.f32.gmra.mxu0 %vm889_vm1, %v1367_v15  ;;  %2438 = vmatpush3.msra.mxu1 %v1841_v32 }
 0x252   :  { %2414 = vmatprep.mubr.msk.f32.mxu0 %vm889_vm1, %v1368_v40  ;;  %2439 = vmatprep.subr.mxu1 %v1840_v19 }
 0x253   :  { %2440 = vmatpush3.msra.mxu1 %v1840_v19 }
 0x254   :  { %2441 = vmatprep.subr.mxu1 %v1839_v35 }
 0x255   :  { %2415 = vmatmul.mubr.msk.f32.gmra.mxu0 %vm889_vm1, %v1369_v63  ;;  %2442 = vmatpush3.msra.mxu1 %v1839_v35 }
 0x256   :  { %2443 = vmatprep.subr.mxu1 %v1838_v11 }
 0x257   :  { %2444 = vmatpush3.msra.mxu1 %v1838_v11 }
 0x258   :  { %2445 = vmatprep.subr.mxu1 %v1837_v58 }
 0x259   :  { %2446 = vmatpush3.msra.mxu1 %v1837_v58 }
 0x25a   :  { %2447 = vmatprep.subr.mxu1 %v1836_v55 }
 0x25b   :  { %2448 = vmatpush3.msra.mxu1 %v1836_v55 }
 0x2d6   :  { %v2371_v52 = vpop.f32.mrf.mxu0 }
 0x2d7   :  { %v1693_v6 = vmul.f32 %v2371_v52, %v2257_v28 }
 0x2d8   :  { %v1533_v34 = vpop.f32.mrf.mxu0 }
 0x2d9   :  { %v1692_v24 = vmul.f32 %v1533_v34, %v497_v36 }
 0x2db   :  { %v1724_v29 = vadd.f32 %v1693_v6, %v1692_v24 }
 0x2dd   :  { %v2374_v61 = vpop.f32.mrf.mxu0  ;;  %v1725_v27 = vrot.slane %v1724_v29, 4 }
 0x2de   :  { %v1695_v59 = vmul.f32 %v2374_v61, %v2260_v62 }
 0x2df   :  { %v1543_v30 = vpop.f32.mrf.mxu0  ;;  %v1726_v16 = vadd.f32 %v1725_v27, %v1724_v29 }
 0x2e0   :  { %v1694_v5 = vmul.f32 %v1543_v30, %v507_v25 }
 0x2e1   :  { %v2377_v54 = vpop.f32.mrf.mxu0  ;;  %v1727_v32 = vrot.slane %v1726_v16, 2 }
 0x2e2   :  { %v1697_v48 = vmul.f32 %v2377_v54, %v2263_v22  ;;  %v1731_v18 = vadd.f32 %v1695_v59, %v1694_v5 }
 0x2e3   :  { %v1553_v13 = vpop.f32.mrf.mxu0 }
 0x2e4   :  { %v1696_v45 = vmul.f32 %v1553_v13, %v517_v21  ;;  %v1732_v4 = vrot.slane %v1731_v18, 4 }
 0x2e5   :  { %v2380_v43 = vpop.f32.mrf.mxu0 }
 0x2e6   :  { %v1738_v60 = vadd.f32 %v1697_v48, %v1696_v45  ;;  %v1699_v33 = vmul.f32 %v2380_v43, %v2266_v53  ;;  %v1733_v63 = vadd.f32 %v1732_v4, %v1731_v18 }
 0x2e7   :  { %v1563_v51 = vpop.f32.mrf.mxu0 }
 0x2e8   :  { %v1698_v50 = vmul.f32 %v1563_v51, %v527_v42  ;;  %v1739_v17 = vrot.slane %v1738_v60, 4  ;;  %v1734_v7 = vrot.slane %v1733_v63, 2 }
 0x2e9   :  { %v2383_v31 = vpop.f32.mrf.mxu0 }
 0x2ea   :  { %v1745_v26 = vadd.f32 %v1699_v33, %v1698_v50  ;;  %v1701_v15 = vmul.f32 %v2383_v31, %v2269_v0  ;;  %v1740_v3 = vadd.f32 %v1739_v17, %v1738_v60  ;;  %v1735_v58 = vadd.f32 %v1734_v7, %v1733_v63 }
 0x2eb   :  { %v1573_v49 = vpop.f32.mrf.mxu0 }
 0x2ec   :  { %v1700_v39 = vmul.f32 %v1573_v49, %v537_v20  ;;  %v1746_v40 = vrot.slane %v1745_v26, 4  ;;  %v1741_v46 = vrot.slane %v1740_v3, 2  ;;  %v1736_v5 = vrot.slane %v1735_v58, 1 }
 0x2ed   :  { %v2386_v44 = vpop.f32.mrf.mxu0 }
 0x2ee   :  { %v1752_v8 = vadd.f32 %v1701_v15, %v1700_v39  ;;  %v1747_v47 = vadd.f32 %v1746_v40, %v1745_v26  ;;  %v1703_v28 = vmul.f32 %v2386_v44, %v2272_v10  ;;  %v1742_v42 = vadd.f32 %v1741_v46, %v1740_v3  ;;  %v3877_v44 = vld [vmem:[#allocation15_spill] sm:$0xff]  ;;  %v3880_v46 = vld [vmem:[#allocation16_spill] sm:$0xff] }
 0x2ef   :  { %v1583_v38 = vpop.f32.mrf.mxu0  ;;  %v1728_v10 = vadd.f32 %v1727_v32, %v1726_v16  ;;  %v1737_v51 = vadd.f32 %v1736_v5, %v1735_v58  ;;  %v3883_v5 = vld [vmem:[#allocation20_spill] sm:$0xff] }
 0x2f0   :  { %v1753_v57 = vrot.slane %v1752_v8, 4  ;;  %v1702_v41 = vmul.f32 %v1583_v38, %v547_v23  ;;  %v1748_v35 = vrot.slane %v1747_v47, 2  ;;  %v1743_v24 = vrot.slane %v1742_v42, 1 }
 0x2f1   :  { %v2389_v36 = vpop.f32.mrf.mxu0  ;;  %v1729_v48 = vrot.slane %v1728_v10, 1 }
 0x2f2   :  { %v1754_v62 = vadd.f32 %v1753_v57, %v1752_v8  ;;  %v1759_v56 = vadd.f32 %v1703_v28, %v1702_v41  ;;  %v1705_v19 = vmul.f32 %v2389_v36, %v2275_v1  ;;  %v1749_v61 = vadd.f32 %v1748_v35, %v1747_v47  ;;  %v3878_v57 = vld [vmem:[#allocation14_spill] sm:$0xff]  ;;  %v3879_v28 = vld [vmem:[#allocation17_spill] sm:$0xff] }
 0x2f3   :  { %v1593_v25 = vpop.f32.mrf.mxu0  ;;  %v1730_v4 = vadd.f32 %v1729_v48, %v1728_v10 }
 0x2f4   :  { %v1704_v22 = vmul.f32 %v1593_v25, %v557_v14  ;;  %v1760_v11 = vrot.slane %v1759_v56, 4  ;;  %v1755_v55 = vrot.slane %v1754_v62, 2  ;;  %v1750_v18 = vrot.slane %v1749_v61, 1 }
 0x2f5   :  { %v2392_v21 = vpop.f32.mrf.mxu0  ;;  %v1876_v15 = vsel %vm1875_vm2, %v1737_v51, %v1730_v4  ;;  %v3885_v51 = vld [vmem:[#allocation22_spill] sm:$0xff] }
 0x2f6   :  { %v1766_v53 = vadd.f32 %v1705_v19, %v1704_v22  ;;  %v1761_v0 = vadd.f32 %v1760_v11, %v1759_v56  ;;  %v1707_v52 = vmul.f32 %v2392_v21, %v2278_v9  ;;  %v1756_v13 = vadd.f32 %v1755_v55, %v1754_v62  ;;  %v3881_v55 = vld [vmem:[#allocation18_spill] sm:$0xff] }
 0x2f7   :  { %v1603_v20 = vpop.f32.mrf.mxu0  ;;  %v1751_v49 = vadd.f32 %v1750_v18, %v1749_v61 }
 0x2f8   :  { %v1767_v23 = vrot.slane %v1766_v53, 4  ;;  %v1706_v34 = vmul.f32 %v1603_v20, %v567_v2  ;;  %v1762_v30 = vrot.slane %v1761_v0, 2  ;;  %v1757_v29 = vrot.slane %v1756_v13, 1 }
 0x2f9   :  { %v2395_v54 = vpop.f32.mrf.mxu0  ;;  %v1744_v2 = vadd.f32 %v1743_v24, %v1742_v42  ;;  %v3882_v42 = vld [vmem:[#allocation19_spill] sm:$0xff] }
 0x2fa   :  { %v1768_v1 = vadd.f32 %v1767_v23, %v1766_v53  ;;  %v1773_v14 = vadd.f32 %v1707_v52, %v1706_v34  ;;  %v1763_v59 = vadd.f32 %v1762_v30, %v1761_v0  ;;  %v1758_v39 = vadd.f32 %v1757_v29, %v1756_v13 }
 0x2fb   :  { %v1613_v45 = vpop.f32.mrf.mxu0  ;;  %v1878_v16 = vsel %vm1877_vm3, %v1744_v2, %v1876_v15  ;;  %v1709_v62 = vmul.f32 %v2395_v54, %v3789_v12  ;;  %v3887_v15 = vld [vmem:[#allocation24_spill] sm:$0xff] }
 0x2fc   :  { %v1769_v43 = vrot.slane %v1768_v1, 2  ;;  %v1774_v6 = vrot.slane %v1773_v14, 4  ;;  %v1764_v50 = vrot.slane %v1763_v59, 1  ;;  %v1708_v3 = vmul.f32 %v1613_v45, %v3791_v37 }
 0x2fd   :  { %v2398_v60 = vpop.f32.mrf.mxu0  ;;  %v1880_v32 = vsel %vm1879_vm4, %v1751_v49, %v1878_v16 }
 0x2fe   :  { %v1770_v33 = vadd.f32 %v1769_v43, %v1768_v1  ;;  %v1775_v9 = vadd.f32 %v1774_v6, %v1773_v14  ;;  %v1765_v8 = vadd.f32 %v1764_v50, %v1763_v59  ;;  %v1711_v47 = vmul.f32 %v2398_v60, %v3878_v57  ;;  %v3884_v1 = vld [vmem:[#allocation21_spill] sm:$0xff] }
 0x2ff   :  { %v1623_v31 = vpop.f32.mrf.mxu0  ;;  %v1882_v37 = vsel %vm1881_vm5, %v1758_v39, %v1880_v32  ;;  %v1780_v22 = vadd.f32 %v1709_v62, %v1708_v3  ;;  %v3889_v62 = vld [vmem:[#allocation26_spill] sm:$0xff] }
 0x300   :  { %v1771_v26 = vrot.slane %v1770_v33, 1  ;;  %v1776_v17 = vrot.slane %v1775_v9, 2  ;;  %v1710_v63 = vmul.f32 %v1623_v31, %v3877_v44  ;;  %v1884_v58 = vsel %vm1883_vm6, %v1765_v8, %v1882_v37 }
 0x301   :  { %v2401_v27 = vpop.f32.mrf.mxu0  ;;  %v1781_v34 = vrot.slane %v1780_v22, 4 }
 0x302   :  { %v1777_v40 = vadd.f32 %v1776_v17, %v1775_v9  ;;  %v1772_v36 = vadd.f32 %v1771_v26, %v1770_v33  ;;  %v1713_v56 = vmul.f32 %v2401_v27, %v3880_v46  ;;  %v1787_v19 = vadd.f32 %v1711_v47, %v1710_v63  ;;  %v3886_v33 = vld [vmem:[#allocation23_spill] sm:$0xff] }
 0x303   :  { %v1633_v38 = vpop.f32.mrf.mxu0  ;;  %v1782_v48 = vadd.f32 %v1781_v34, %v1780_v22 }
 0x304   :  { %v1712_v41 = vmul.f32 %v1633_v38, %v3879_v28  ;;  %v1778_v7 = vrot.slane %v1777_v40, 1  ;;  %v1886_v0 = vsel %vm1885_vm7, %v1772_v36, %v1884_v58  ;;  %v1788_v23 = vrot.slane %v1787_v19, 4 }
 0x305   :  { %v2404_v25 = vpop.f32.mrf.mxu0  ;;  %v1783_v4 = vrot.slane %v1782_v48, 2 }
 0x306   :  { %v1794_v35 = vadd.f32 %v1713_v56, %v1712_v41  ;;  %v1779_v21 = vadd.f32 %v1778_v7, %v1777_v40  ;;  %v1715_v53 = vmul.f32 %v2404_v25, %v3881_v55  ;;  %v1789_v59 = vadd.f32 %v1788_v23, %v1787_v19  ;;  %v3888_v40 = vld [vmem:[#allocation25_spill] sm:$0xff]  ;;  %v3890_v56 = vld [vmem:[#allocation27_spill] sm:$0xff] }
 0x307   :  { %v1643_v11 = vpop.f32.mrf.mxu0  ;;  %v1784_v57 = vadd.f32 %v1783_v4, %v1782_v48 }
 0x308   :  { %v1714_v12 = vmul.f32 %v1643_v11, %v3882_v42  ;;  %v1888_v10 = vsel %vm1887_vm8, %v1779_v21, %v1886_v0  ;;  %v1795_v61 = vrot.slane %v1794_v35, 4  ;;  %v1790_v50 = vrot.slane %v1789_v59, 2 }
 0x309   :  { %v2407_v20 = vpop.f32.mrf.mxu0  ;;  %2449 = vmatprep.mubr.f32.mxu1 %v1888_v10  ;;  %1973 = vst [vmem:[#allocation8] sm:$0xff] %v1888_v10  ;;  %v1785_v58 = vrot.slane %v1784_v57, 1 }
 0x30a   :  { %v1801_v52 = vadd.f32 %v1715_v53, %v1714_v12  ;;  %v1717_v13 = vmul.f32 %v2407_v20, %v3883_v5  ;;  %v1796_v43 = vadd.f32 %v1795_v61, %v1794_v35  ;;  %v1791_v38 = vadd.f32 %v1790_v50, %v1789_v59 }
 0x30b   :  { %v1653_v30 = vpop.f32.mrf.mxu0  ;;  %v1786_v34 = vadd.f32 %v1785_v58, %v1784_v57 }
 0x30c   :  { %v1802_v54 = vrot.slane %v1801_v52, 4  ;;  %v1716_v14 = vmul.f32 %v1653_v30, %v3884_v1  ;;  %v1797_v26 = vrot.slane %v1796_v43, 2  ;;  %v1792_v37 = vrot.slane %v1791_v38, 1 }
 0x30d   :  { %v2410_v24 = vpop.f32.mrf.mxu0 }
 0x30e   :  { %v1808_v45 = vadd.f32 %v1717_v13, %v1716_v14  ;;  %v1803_v18 = vadd.f32 %v1802_v54, %v1801_v52  ;;  %v1719_v29 = vmul.f32 %v2410_v24, %v3885_v51  ;;  %v1798_v47 = vadd.f32 %v1797_v26, %v1796_v43 }
 0x30f   :  { %v1663_v6 = vpop.f32.mrf.mxu0  ;;  %v1793_v0 = vadd.f32 %v1792_v37, %v1791_v38 }
 0x310   :  { %v1809_v60 = vrot.slane %v1808_v45, 4  ;;  %v1718_v9 = vmul.f32 %v1663_v6, %v3886_v33  ;;  %v1804_v27 = vrot.slane %v1803_v18, 2  ;;  %v1799_v11 = vrot.slane %v1798_v47, 1 }
 0x311   :  { %v2413_v2 = vpop.f32.mrf.mxu0  ;;  %v1889_v13 = vsel %vm1875_vm2, %v1793_v0, %v1786_v34 }
 0x312   :  { %v1810_v31 = vadd.f32 %v1809_v60, %v1808_v45  ;;  %v1815_v17 = vadd.f32 %v1719_v29, %v1718_v9  ;;  %v1721_v39 = vmul.f32 %v2413_v2, %v3887_v15  ;;  %v1805_v36 = vadd.f32 %v1804_v27, %v1803_v18 }
 0x313   :  { %v1673_v49 = vpop.f32.mrf.mxu0  ;;  %v1800_v52 = vadd.f32 %v1799_v11, %v1798_v47 }
 0x314   :  { %v1720_v44 = vmul.f32 %v1673_v49, %v3888_v40  ;;  %v1811_v63 = vrot.slane %v1810_v31, 2  ;;  %v1816_v8 = vrot.slane %v1815_v17, 4  ;;  %v1806_v55 = vrot.slane %v1805_v36, 1 }
 0x315   :  { %v2416_v3 = vpop.f32.mrf.mxu0  ;;  %v1890_v24 = vsel %vm1877_vm3, %v1800_v52, %v1889_v13 }
 0x316   :  { %v1822_v16 = vadd.f32 %v1721_v39, %v1720_v44  ;;  %v1817_v28 = vadd.f32 %v1816_v8, %v1815_v17  ;;  %v1723_v46 = vmul.f32 %v2416_v3, %v3889_v62  ;;  %v1812_v32 = vadd.f32 %v1811_v63, %v1810_v31 }
 0x317   :  { %v1683_v41 = vpop.f32.mrf.mxu0  ;;  %v1807_v61 = vadd.f32 %v1806_v55, %v1805_v36 }
 0x318   :  { %v1823_v7 = vrot.slane %v1822_v16, 4  ;;  %v1722_v25 = vmul.f32 %v1683_v41, %v3890_v56  ;;  %v1818_v19 = vrot.slane %v1817_v28, 2  ;;  %v1813_v12 = vrot.slane %v1812_v32, 1 }
 0x319   :  { %v1891_v45 = vsel %vm1879_vm4, %v1807_v61, %v1890_v24 }
 0x31a   :  { %v1824_v22 = vadd.f32 %v1823_v7, %v1822_v16  ;;  %v1829_v35 = vadd.f32 %v1723_v46, %v1722_v25  ;;  %v1819_v21 = vadd.f32 %v1818_v19, %v1817_v28  ;;  %v1814_v5 = vadd.f32 %v1813_v12, %v1812_v32 }
 0x31c   :  { %v1825_v53 = vrot.slane %v1824_v22, 2  ;;  %v1830_v42 = vrot.slane %v1829_v35, 4  ;;  %v1820_v20 = vrot.slane %v1819_v21, 1  ;;  %v1892_v43 = vsel %vm1881_vm5, %v1814_v5, %v1891_v45 }
 0x31e   :  { %v1826_v10 = vadd.f32 %v1825_v53, %v1824_v22  ;;  %v1831_v23 = vadd.f32 %v1830_v42, %v1829_v35  ;;  %v1821_v1 = vadd.f32 %v1820_v20, %v1819_v21 }
 0x320   :  { %v1827_v30 = vrot.slane %v1826_v10, 1  ;;  %v1832_v54 = vrot.slane %v1831_v23, 2  ;;  %v1893_v18 = vsel %vm1883_vm6, %v1821_v1, %v1892_v43 }
 0x322   :  { %v1833_v14 = vadd.f32 %v1832_v54, %v1831_v23  ;;  %v1828_v59 = vadd.f32 %v1827_v30, %v1826_v10 }
 0x324   :  { %v1834_v48 = vrot.slane %v1833_v14, 1  ;;  %v1894_v60 = vsel %vm1885_vm7, %v1828_v59, %v1893_v18 }
 0x326   :  { %v1835_v6 = vadd.f32 %v1834_v48, %v1833_v14 }
 0x328   :  { %v1895_v51 = vsel %vm1887_vm8, %v1835_v6, %v1894_v60 }
 0x329   :  { %2450 = vmatmul.mubr.f32.vlgmr.msra.gmra.mxu1 %v1895_v51  ;;  %1974 = vst [vmem:[#allocation8 + $0x8] sm:$0xff] %v1895_v51 }
 0x32a   :  { %2623 = shalt.err (!%p2620_p0)
}
 0x32b   :  { %2000 = dma.vmem_to_hbm [thread:$0]  %s1995_s20, 256, %s3845_s7, [#allocation9], %s2661_s27, %s2661_s27, %s2662_s28  }
 0x32c   :  { %v2107_v29 = vld [vmem:[%s3843_s5] ss:$0 sm:$0xff]  ;;  %s2665_s26 = smov [#allocation7]  }
 0x32d   :  { %s1982_s1 = sshll.u32 %s2665_s26, 4  ;;  %s1983_s1 = int_to_ptr.vmem [resolvable:$true] %s1982_s1 }
 0x32e   :  { %s2632_s29 = scalar_lea.vmem %s1983_s1, 256  ;;  %p2637_p2 = scmp.lt.s32.totalorder %s1983_s1, %s1983_s1 }
 0x32f   :  { %p2633_p1 = scmp.ne.s32.totalorder %s1983_s1, %s2632_s29  ;;  %p2638_p3 = scmp.lt.s32.totalorder %s2632_s29, %s2632_s29 }
 0x331   :  { %p2639_p4 = por %p2638_p3, %p2637_p2 }
 0x333   :  { %p2640_p5 = pnand %p2639_p4, %p2633_p1 }
 0x3e9   :  { %v2451_v33 = vpop.f32.mrf.mxu1 }
 0x3ea   :  { %v1970_v9 = vadd.f32 %v2451_v33, %v2107_v29 }
 0x3eb   :  { %v1964_v2 = vpop.f32.mrf.mxu1 }
 0x3ec   :  { %1976 = vst [vmem:[#allocation7 + $0x8] sm:$0xff] %v1970_v9  ;;  %v1965_v50 = vadd.f32 %v2107_v29, %v1964_v2 }
 0x3ee   :  { %1975 = vst [vmem:[#allocation7] sm:$0xff] %v1965_v50 }
 0x3ef   :  { %2643 = shalt.err (!%p2640_p5)
}
 0x3f0   :  { %1988 = dma.vmem_to_hbm [thread:$0]  %s1983_s1, 256, %s3844_s6, [#allocation4], %s2661_s27, %s2661_s27, %s2662_s28  }
 0x3f1   :  { %2656 = dma.done.wait [#allocation4], 256  }
 0x3f2   :  { %2657 = vsyncadd [#allocation4], 4294967040 }
 0x3f3   :  { %2658 = dma.done.wait [#allocation9], 256  }
 0x3f4   :  { %2659 = vsyncadd [#allocation9], 4294967040 }
 0x3f5   :  { %2007 = vsyncpa [#allocation3], 1 }
 0x3f6   :  { %2008 = vsyncpa [#allocation6], 1 }
 0x3f7   :  { %2009 = vsyncpa [#allocation4], 1 }
 0x3f8   :  { %2010 = vsyncpa [#allocation9], 1 }

</bundles_post_ra>
